<compile_context>
chip_gen: v5e
topology: v5e:2x2
jax: 0.10.0
libtpu: 0.0.40
codegen_flags: <defaults>
</compile_context>

<pallas_src>
import math
import functools

import jax
import jax.numpy as jnp
from jax import lax
from jax.experimental import pallas as pl
from jax.experimental.pallas import tpu as pltpu

NEG_INF = -1e30                    # additive causal-mask value (f32-safe)
VMEM_LIMIT = 32 * 1024 * 1024      # safe on v5e/v6e (128 MiB) and v7x (64 MiB)


def _round_up(x, m):
    return ((x + m - 1) // m) * m


def _pad2(a, Mp, Np):
    M, N = a.shape
    if (M, N) == (Mp, Np):
        return a
    return jnp.pad(a, ((0, Mp - M), (0, Np - N)))


# ----------------------------- Pallas kernels -----------------------------

def _matmul_kernel(x_ref, w_ref, b_ref, o_ref, acc_ref, *, relu):
    """Tiled y = x @ w + b (optional ReLU). Grid (M/tm, N/tn, K/tk); K is the reduction."""
    @pl.when(pl.program_id(2) == 0)
    def _():
        acc_ref[...] = jnp.zeros_like(acc_ref)

    acc_ref[...] += jnp.dot(x_ref[...], w_ref[...],
                            preferred_element_type=jnp.float32)

    @pl.when(pl.program_id(2) == pl.num_programs(2) - 1)
    def _():
        y = acc_ref[...] + b_ref[...]
        if relu:
            y = jnp.maximum(y, 0.0)
        o_ref[...] = y.astype(o_ref.dtype)


def _matmul_res_ln_kernel(x_ref, w_ref, b_ref, r_ref, g_ref, bt_ref, o_ref, acc_ref):
    """Fused: LayerNorm(residual + (x @ w + b)). Grid (M/tm, K/tk); full N (=d_model) per tile."""
    @pl.when(pl.program_id(1) == 0)
    def _():
        acc_ref[...] = jnp.zeros_like(acc_ref)

    acc_ref[...] += jnp.dot(x_ref[...], w_ref[...],
                            preferred_element_type=jnp.float32)

    @pl.when(pl.program_id(1) == pl.num_programs(1) - 1)
    def _():
        y = acc_ref[...] + b_ref[...] + r_ref[...].astype(jnp.float32)
        mu = jnp.mean(y, axis=-1, keepdims=True)
        var = jnp.mean(jnp.square(y - mu), axis=-1, keepdims=True)
        yn = (y - mu) * lax.rsqrt(var + 1e-5)
        o_ref[...] = (yn * g_ref[...] + bt_ref[...]).astype(o_ref.dtype)


def _layernorm_kernel(x_ref, g_ref, b_ref, o_ref):
    x = x_ref[...].astype(jnp.float32)
    mu = jnp.mean(x, axis=-1, keepdims=True)
    var = jnp.mean(jnp.square(x - mu), axis=-1, keepdims=True)
    y = (x - mu) * lax.rsqrt(var + 1e-5)
    o_ref[...] = (y * g_ref[...] + b_ref[...]).astype(o_ref.dtype)


def _mha_kernel(q_ref, kv_ref, m_ref, o_ref, *, n_heads, dh):
    """One batch element per grid step; heads are channel slices of the fused projections.

    q_ref:  (1, Sq, D)   bf16, already scaled by 1/sqrt(dh) via the folded Q weights
    kv_ref: (1, Sk, 2D)  bf16, K in [:, :D], V in [:, D:]
    m_ref:  (Sq, Sk)     f32 additive mask
    o_ref:  (1, Sq, D)   f32, head h written to channels [h*dh:(h+1)*dh] (lane-dense store)
    """
    D = n_heads * dh
    q_all = q_ref[0]                 # (Sq, D)  bf16
    kv_all = kv_ref[0]               # (Sk, 2D) bf16
    mask = m_ref[...]                # (Sq, Sk) f32

    head_outs = []
    for h in range(n_heads):
        q = q_all[:, h * dh:(h + 1) * dh]                  # (Sq, dh)
        k = kv_all[:, h * dh:(h + 1) * dh]                 # (Sk, dh)
        v = kv_all[:, D + h * dh:D + (h + 1) * dh]         # (Sk, dh)
        # scores: contract dh of q with dh of k (no in-kernel transpose of K)
        s = lax.dot_general(q, k, (((1,), (1,)), ((), ())),
                            preferred_element_type=jnp.float32) + mask
        s = s - jnp.max(s, axis=-1, keepdims=True)
        p = jnp.exp(s)
        p = p * pl.reciprocal(jnp.sum(p, axis=-1, keepdims=True), approx=True)
        o = lax.dot_general(p.astype(v.dtype), v, (((1,), (0,)), ((), ())),
                            preferred_element_type=jnp.float32)
        head_outs.append(o)
    o_ref[0] = jnp.concatenate(head_outs, axis=-1).astype(o_ref.dtype)


# ------------------------------ kernel wrappers ------------------------------

def linear_pallas(x, w, b, *, relu=False, tm=256, tn=256, tk=512):
    """y = x @ w + b (optional ReLU). x:(M,K) f32, w:(K,N) bf16, b:(N,) f32 -> (M,N) f32."""
    M, K = x.shape
    N = w.shape[1]
    tm = min(tm, _round_up(M, 8))
    tk = min(tk, _round_up(K, 128))
    tn = min(tn, _round_up(N, 128))
    Mp, Kp, Np = _round_up(M, tm), _round_up(K, tk), _round_up(N, tn)

    xp = _pad2(x, Mp, Kp).astype(jnp.bfloat16)
    wp = _pad2(w, Kp, Np).astype(jnp.bfloat16)
    bp = jnp.pad(b, (0, Np - N)) if Np != N else b

    gm, gn, gk = Mp // tm, Np // tn, Kp // tk
    out = pl.pallas_call(
        functools.partial(_matmul_kernel, relu=relu),
        out_shape=jax.ShapeDtypeStruct((Mp, Np), jnp.float32),
        grid=(gm, gn, gk),
        in_specs=[
            pl.BlockSpec((tm, tk), lambda i, j, k: (i, k)),
            pl.BlockSpec((tk, tn), lambda i, j, k: (k, j)),
            pl.BlockSpec((1, tn), lambda i, j, k: (0, j)),
        ],
        out_specs=pl.BlockSpec((tm, tn), lambda i, j, k: (i, j)),
        scratch_shapes=[pltpu.VMEM((tm, tn), jnp.float32)],
        compiler_params=pltpu.CompilerParams(
            dimension_semantics=("parallel", "parallel", "arbitrary"),
            vmem_limit_bytes=VMEM_LIMIT),
    )(xp, wp, bp.reshape(1, Np))
    return out[:M, :N] if (Mp, Np) != (M, N) else out


def linear_res_ln_pallas(x, w, b, res, gamma, beta, *, tm=256, tk=512):
    """LayerNorm(res + x @ w + b). w:(K,D) bf16; res/out:(M,D) f32. Full D kept per tile."""
    M, K = x.shape
    N = w.shape[1]                       # == d_model; NOT padded (LN normalizes over it)
    tm = min(tm, _round_up(M, 8))
    tk = min(tk, _round_up(K, 128))
    Mp, Kp = _round_up(M, tm), _round_up(K, tk)

    xp = _pad2(x, Mp, Kp).astype(jnp.bfloat16)
    wp = _pad2(w, Kp, N).astype(jnp.bfloat16)
    rp = _pad2(res, Mp, N)

    gm, gk = Mp // tm, Kp // tk
    out = pl.pallas_call(
        _matmul_res_ln_kernel,
        out_shape=jax.ShapeDtypeStruct((Mp, N), jnp.float32),
        grid=(gm, gk),
        in_specs=[
            pl.BlockSpec((tm, tk), lambda i, k: (i, k)),
            pl.BlockSpec((tk, N), lambda i, k: (k, 0)),
            pl.BlockSpec((1, N), lambda i, k: (0, 0)),
            pl.BlockSpec((tm, N), lambda i, k: (i, 0)),
            pl.BlockSpec((1, N), lambda i, k: (0, 0)),
            pl.BlockSpec((1, N), lambda i, k: (0, 0)),
        ],
        out_specs=pl.BlockSpec((tm, N), lambda i, k: (i, 0)),
        scratch_shapes=[pltpu.VMEM((tm, N), jnp.float32)],
        compiler_params=pltpu.CompilerParams(
            dimension_semantics=("parallel", "arbitrary"),
            vmem_limit_bytes=VMEM_LIMIT),
    )(xp, wp, b.reshape(1, N), rp, gamma.reshape(1, N), beta.reshape(1, N))
    return out[:M] if Mp != M else out


def layernorm_pallas(x, gamma, beta, *, tm=256):
    """LayerNorm over last dim. x:(M,D) f32. eps=1e-5 (PyTorch default)."""
    M, D = x.shape
    tm = min(tm, _round_up(M, 8))
    Mp = _round_up(M, tm)
    xp = _pad2(x, Mp, D)
    out = pl.pallas_call(
        _layernorm_kernel,
        out_shape=jax.ShapeDtypeStruct((Mp, D), jnp.float32),
        grid=(Mp // tm,),
        in_specs=[
            pl.BlockSpec((tm, D), lambda i: (i, 0)),
            pl.BlockSpec((1, D), lambda i: (0, 0)),
            pl.BlockSpec((1, D), lambda i: (0, 0)),
        ],
        out_specs=pl.BlockSpec((tm, D), lambda i: (i, 0)),
        compiler_params=pltpu.CompilerParams(
            dimension_semantics=("parallel",),
            vmem_limit_bytes=VMEM_LIMIT),
    )(xp, gamma.reshape(1, D), beta.reshape(1, D))
    return out[:M] if Mp != M else out


def attention_pallas(q, kv, mask, n_heads):
    """q:(B,Sq,D), kv:(B,Sk,2D) (K|V fused on channels), mask:(Sq,Sk) additive -> (B,Sq,D)."""
    B, Sq, D = q.shape
    Sk = kv.shape[1]
    dh = D // n_heads
    return pl.pallas_call(
        functools.partial(_mha_kernel, n_heads=n_heads, dh=dh),
        out_shape=jax.ShapeDtypeStruct((B, Sq, D), jnp.float32),
        grid=(B,),
        in_specs=[
            pl.BlockSpec((1, Sq, D), lambda i: (i, 0, 0)),
            pl.BlockSpec((1, Sk, 2 * D), lambda i: (i, 0, 0)),
            pl.BlockSpec((Sq, Sk), lambda i: (0, 0)),
        ],
        out_specs=pl.BlockSpec((1, Sq, D), lambda i: (i, 0, 0)),
        compiler_params=pltpu.CompilerParams(
            dimension_semantics=("parallel",),
            vmem_limit_bytes=VMEM_LIMIT),
    )(q.astype(jnp.bfloat16), kv.astype(jnp.bfloat16), mask)


# ------------------------- model glue (plain JAX) -------------------------

def positional_encoding(seq_len, d):
    pos = jnp.arange(seq_len, dtype=jnp.float32)
    freq = 1.0 / (10000.0 ** (jnp.arange(0.0, d, 2.0, dtype=jnp.float32) / d))
    inp = jnp.outer(pos, freq)                                  # (S, d/2)
    return jnp.concatenate([jnp.sin(inp), jnp.cos(inp)], -1)    # (S, d)  -- [sin | cos] as in spec


def transformer_embedding(emb_table, tokens):
    d_model = emb_table.shape[1]
    S = tokens.shape[1]
    emb = jnp.take(emb_table, tokens, axis=0) * math.sqrt(d_model)   # (B, S, D)
    return emb + positional_encoding(S, d_model)[None, :, :]


def causal_mask(S):
    return jnp.where(jnp.triu(jnp.ones((S, S), jnp.bool_), k=1), NEG_INF, 0.0)


def self_attention_core(p, x, mask, n_heads):
    """Fused QKV projection + attention; out-projection is fused into the caller's res+LN."""
    B, S, D = x.shape
    qkv = linear_pallas(x.reshape(B * S, D), p["w_qkv"], p["b_qkv"])    # (B*S, 3D)
    q = qkv[:, :D].reshape(B, S, D)
    kv = qkv[:, D:].reshape(B, S, 2 * D)
    return attention_pallas(q, kv, mask, n_heads)                       # (B, S, D)


def cross_attention_core(p, x_q, memory, mask, n_heads):
    B, Sq, D = x_q.shape
    Sk = memory.shape[1]
    q = linear_pallas(x_q.reshape(B * Sq, D), p["w_q"], p["b_q"]).reshape(B, Sq, D)
    kv = linear_pallas(memory.reshape(B * Sk, D), p["w_kv"], p["b_kv"]).reshape(B, Sk, 2 * D)
    return attention_pallas(q, kv, mask, n_heads)


def encoder_layer(p, x, mask, n_heads):
    B, S, D = x.shape
    x2 = x.reshape(B * S, D)
    sa = self_attention_core(p["self_attn"], x, mask, n_heads).reshape(B * S, D)
    x2 = linear_res_ln_pallas(sa, p["self_attn"]["w_out"], p["self_attn"]["b_out"],
                              x2, p["ln1_g"], p["ln1_b"])
    h = linear_pallas(x2, p["ff_w1"], p["ff_b1"], relu=True)
    x2 = linear_res_ln_pallas(h, p["ff_w2"], p["ff_b2"], x2, p["ln2_g"], p["ln2_b"])
    return x2.reshape(B, S, D)


def decoder_layer(p, x, memory, tgt_mask, mem_mask, n_heads):
    B, S, D = x.shape
    x2 = x.reshape(B * S, D)
    sa = self_attention_core(p["self_attn"], x, tgt_mask, n_heads).reshape(B * S, D)
    x2 = linear_res_ln_pallas(sa, p["self_attn"]["w_out"], p["self_attn"]["b_out"],
                              x2, p["ln1_g"], p["ln1_b"])
    ca = cross_attention_core(p["cross_attn"], x2.reshape(B, S, D), memory,
                              mem_mask, n_heads).reshape(B * S, D)
    x2 = linear_res_ln_pallas(ca, p["cross_attn"]["w_out"], p["cross_attn"]["b_out"],
                              x2, p["ln2_g"], p["ln2_b"])
    h = linear_pallas(x2, p["ff_w1"], p["ff_b1"], relu=True)
    x2 = linear_res_ln_pallas(h, p["ff_w2"], p["ff_b2"], x2, p["ln3_g"], p["ln3_b"])
    return x2.reshape(B, S, D)


def pt_transformer_forward(params, src, trg, *, n_heads):
    d_model = params["enc_emb"].shape[1]
    B, Ss = src.shape
    _, St = trg.shape

    enc_x = transformer_embedding(params["enc_emb"], src)   # dropout(p) -> identity (eval)
    dec_x = transformer_embedding(params["dec_emb"], trg)   # dropout(0.0)

    src_mask = causal_mask(Ss)   # pt_Transformer applies a causal mask to the ENCODER too
    trg_mask = causal_mask(St)
    mem_mask = jnp.zeros((St, Ss), jnp.float32)

    x = enc_x
    for lp in params["enc_layers"]:
        x = encoder_layer(lp, x, src_mask, n_heads)
    memory = layernorm_pallas(x.reshape(B * Ss, d_model),
                              params["enc_norm_g"], params["enc_norm_b"]).reshape(B, Ss, d_model)

    y = dec_x
    for lp in params["dec_layers"]:
        y = decoder_layer(lp, y, memory, trg_mask, mem_mask, n_heads)
    y = layernorm_pallas(y.reshape(B * St, d_model),
                         params["dec_norm_g"], params["dec_norm_b"])

    out = linear_pallas(y, params["final_w"], params["final_b"])
    return out.reshape(B, St, -1)   # == PyTorch's out.permute(1, 0, 2): (B, S_trg, trg_vcbsz)


# ---------------------- weight preparation (one-time) ----------------------

def prepare_params(p, *, n_heads):
    """PyTorch-layout params -> kernel layout: pre-transposed (K,N) bf16 matmul weights,
    fused QKV / KV projections, 1/sqrt(dh) folded into the Q projection."""
    D = p["enc_emb"].shape[1]
    dh = D // n_heads
    scale = 1.0 / math.sqrt(dh)

    def bf(w):  # (out, in) PyTorch weight -> (in, out) bf16
        return w.T.astype(jnp.bfloat16)

    def prep_self(m):
        w, b = m["in_proj_w"], m["in_proj_b"]                    # (3D, D), (3D,)
        w_qkv = jnp.concatenate([w[:D] * scale, w[D:]], 0)       # fold scale into Q
        b_qkv = jnp.concatenate([b[:D] * scale, b[D:]], 0)
        return dict(w_qkv=bf(w_qkv), b_qkv=b_qkv,
                    w_out=bf(m["out_proj_w"]), b_out=m["out_proj_b"])

    def prep_cross(m):
        w, b = m["in_proj_w"], m["in_proj_b"]
        return dict(w_q=bf(w[:D] * scale), b_q=b[:D] * scale,
                    w_kv=bf(w[D:]), b_kv=b[D:],
                    w_out=bf(m["out_proj_w"]), b_out=m["out_proj_b"])

    def prep_enc(lp):
        return dict(self_attn=prep_self(lp["self_attn"]),
                    ff_w1=bf(lp["ff_w1"]), ff_b1=lp["ff_b1"],
                    ff_w2=bf(lp["ff_w2"]), ff_b2=lp["ff_b2"],
                    ln1_g=lp["ln1_g"], ln1_b=lp["ln1_b"],
                    ln2_g=lp["ln2_g"], ln2_b=lp["ln2_b"])

    def prep_dec(lp):
        d = prep_enc(lp)
        d["cross_attn"] = prep_cross(lp["cross_attn"])
        d["ln3_g"], d["ln3_b"] = lp["ln3_g"], lp["ln3_b"]
        return d

    return dict(
        enc_emb=p["enc_emb"], dec_emb=p["dec_emb"],
        enc_layers=[prep_enc(lp) for lp in p["enc_layers"]],
        dec_layers=[prep_dec(lp) for lp in p["dec_layers"]],
        enc_norm_g=p["enc_norm_g"], enc_norm_b=p["enc_norm_b"],
        dec_norm_g=p["dec_norm_g"], dec_norm_b=p["dec_norm_b"],
        final_w=bf(p["final_w"]), final_b=p["final_b"],
    )


# --------------------------- deterministic init ---------------------------

class KeyGen:
    def __init__(self, key):
        self.key = key

    def __call__(self):
        self.key, sub = jax.random.split(self.key)
        return sub


def init_params(key, *, src_vcbsz, trg_vcbsz, d_model, d_inner,
                n_enc_layers, n_dec_layers):
    kg = KeyGen(key)

    def wn(shape, scale=0.02):
        return scale * jax.random.normal(kg(), shape, jnp.float32)

    def mha():
        return dict(in_proj_w=wn((3 * d_model, d_model)),
                    in_proj_b=wn((3 * d_model,), 0.01),
                    out_proj_w=wn((d_model, d_model)),
                    out_proj_b=wn((d_model,), 0.01))

    def ln():
        return 1.0 + wn((d_model,), 0.01), wn((d_model,), 0.01)

    def enc_layer():
        g1, b1 = ln(); g2, b2 = ln()
        return dict(self_attn=mha(),
                    ff_w1=wn((d_inner, d_model)), ff_b1=wn((d_inner,), 0.01),
                    ff_w2=wn((d_model, d_inner)), ff_b2=wn((d_model,), 0.01),
                    ln1_g=g1, ln1_b=b1, ln2_g=g2, ln2_b=b2)

    def dec_layer():
        g1, b1 = ln(); g2, b2 = ln(); g3, b3 = ln()
        return dict(self_attn=mha(), cross_attn=mha(),
                    ff_w1=wn((d_inner, d_model)), ff_b1=wn((d_inner,), 0.01),
                    ff_w2=wn((d_model, d_inner)), ff_b2=wn((d_model,), 0.01),
                    ln1_g=g1, ln1_b=b1, ln2_g=g2, ln2_b=b2, ln3_g=g3, ln3_b=b3)

    eg, eb = ln()
    dg, db = ln()
    return dict(
        enc_emb=wn((src_vcbsz, d_model), 1.0),
        dec_emb=wn((trg_vcbsz, d_model), 1.0),
        enc_layers=[enc_layer() for _ in range(n_enc_layers)],
        dec_layers=[dec_layer() for _ in range(n_dec_layers)],
        enc_norm_g=eg, enc_norm_b=eb,
        dec_norm_g=dg, dec_norm_b=db,
        final_w=wn((trg_vcbsz, d_model)), final_b=wn((trg_vcbsz,), 0.01),
    )


# --------------------------------- main ------------------------------------

if __name__ == "__main__":
    # Small shapes consistent with the module (d_model % n_heads == 0).
    B, S_src, S_trg = 2, 8, 8
    src_vcbsz, trg_vcbsz = 50, 60
    d_model, n_heads, d_inner = 32, 4, 64
    n_enc_layers, n_dec_layers = 2, 2

    root = jax.random.PRNGKey(0)
    k_params, k_src, k_trg = jax.random.split(root, 3)

    raw_params = init_params(k_params, src_vcbsz=src_vcbsz, trg_vcbsz=trg_vcbsz,
                             d_model=d_model, d_inner=d_inner,
                             n_enc_layers=n_enc_layers, n_dec_layers=n_dec_layers)
    params = prepare_params(raw_params, n_heads=n_heads)   # one-time transpose/fuse/bf16

    src = jax.random.randint(k_src, (B, S_src), 0, src_vcbsz, dtype=jnp.int32)
    trg = jax.random.randint(k_trg, (B, S_trg), 0, trg_vcbsz, dtype=jnp.int32)

    fwd = jax.jit(functools.partial(pt_transformer_forward, n_heads=n_heads))
    out = fwd(params, src, trg)
    out = jax.block_until_ready(out)

    assert out.shape == (B, S_trg, trg_vcbsz), out.shape
    assert bool(jnp.all(jnp.isfinite(out)))
    print("KERNEL_OK")
</pallas_src>

<mosaic_0001>
module attributes {stable_mosaic.version = 11 : i64} {
  func.func @_matmul_kernel(%arg0: i32, %arg1: i32, %arg2: i32, %arg3: memref<16x128xbf16, #tpu.memory_space<vmem>>, %arg4: memref<128x128xbf16, #tpu.memory_space<vmem>>, %arg5: memref<1x128xf32, #tpu.memory_space<vmem>>, %arg6: memref<16x128xf32, #tpu.memory_space<vmem>>, %arg7: memref<16x128xf32, #tpu.memory_space<vmem>>) attributes {dimension_semantics = [#tpu.dimension_semantics<parallel>, #tpu.dimension_semantics<parallel>, #tpu.dimension_semantics<arbitrary>], iteration_bounds = array<i64: 1, 1, 1>, scalar_prefetch = 0 : i64, scratch_operands = 1 : i64, tpu.core_type = #tpu.core_type<tc>, window_params = [{transform_indices = @transform_0, window_bounds = array<i64: 16, 128>}, {transform_indices = @transform_1, window_bounds = array<i64: 128, 128>}, {transform_indices = @transform_2, window_bounds = array<i64: 1, 128>}, {transform_indices = @transform_3, window_bounds = array<i64: 16, 128>}]} {
    %c0_i32 = arith.constant 0 : i32
    %0 = arith.cmpi eq, %arg2, %c0_i32 : i32
    %1 = arith.extui %0 : i1 to i32
    %c0_i32_0 = arith.constant 0 : i32
    %2 = arith.cmpi ne, %1, %c0_i32_0 : i32
    scf.if %2 {
      %cst_10 = arith.constant 0.000000e+00 : f32
      %12 = vector.broadcast %cst_10 : f32 to vector<16x128xf32>
      %c0_11 = arith.constant 0 : index
      %c0_12 = arith.constant 0 : index
      %13 = vector.load %arg7[%c0_11, %c0_12] : memref<16x128xf32, #tpu.memory_space<vmem>>, vector<16x128xf32>
      tpu.vector_store %arg7[%c0_11, %c0_12], %12 {strides = array<i32>} : memref<16x128xf32, #tpu.memory_space<vmem>>, vector<16x128xf32>,
    } else {
    }
    %c0 = arith.constant 0 : index
    %c0_1 = arith.constant 0 : index
    %3 = vector.load %arg7[%c0, %c0_1] : memref<16x128xf32, #tpu.memory_space<vmem>>, vector<16x128xf32>
    %c0_2 = arith.constant 0 : index
    %c0_3 = arith.constant 0 : index
    %4 = vector.load %arg3[%c0_2, %c0_3] : memref<16x128xbf16, #tpu.memory_space<vmem>>, vector<16x128xbf16>
    %c0_4 = arith.constant 0 : index
    %c0_5 = arith.constant 0 : index
    %5 = vector.load %arg4[%c0_4, %c0_5] : memref<128x128xbf16, #tpu.memory_space<vmem>>, vector<128x128xbf16>
    %cst = arith.constant dense<0.000000e+00> : vector<16x128xf32>
    %6 = tpu.matmul %4, %5, %cst {dimension_numbers = #tpu.dot_dimension_numbers<[1], [0], [0], [1], [0, 0, 1, 1], [], []>} : vector<16x128xbf16>, vector<128x128xbf16>, vector<16x128xf32> -> vector<16x128xf32>
    %7 = arith.addf %3, %6 : vector<16x128xf32>
    %c0_6 = arith.constant 0 : index
    %c0_7 = arith.constant 0 : index
    %8 = vector.load %arg7[%c0_6, %c0_7] : memref<16x128xf32, #tpu.memory_space<vmem>>, vector<16x128xf32>
    tpu.vector_store %arg7[%c0_6, %c0_7], %7 {strides = array<i32>} : memref<16x128xf32, #tpu.memory_space<vmem>>, vector<16x128xf32>,
    %c0_i32_8 = arith.constant 0 : i32
    %9 = arith.cmpi eq, %arg2, %c0_i32_8 : i32
    %10 = arith.extui %9 : i1 to i32
    %c0_i32_9 = arith.constant 0 : i32
    %11 = arith.cmpi ne, %10, %c0_i32_9 : i32
    scf.if %11 {
      %c0_10 = arith.constant 0 : index
      %c0_11 = arith.constant 0 : index
      %12 = vector.load %arg7[%c0_10, %c0_11] : memref<16x128xf32, #tpu.memory_space<vmem>>, vector<16x128xf32>
      %c0_12 = arith.constant 0 : index
      %c0_13 = arith.constant 0 : index
      %13 = vector.load %arg5[%c0_12, %c0_13] : memref<1x128xf32, #tpu.memory_space<vmem>>, vector<1x128xf32>
      %14 = vector.broadcast %13 : vector<1x128xf32> to vector<16x128xf32>
      %15 = arith.addf %12, %14 : vector<16x128xf32>
      %c0_14 = arith.constant 0 : index
      %c0_15 = arith.constant 0 : index
      %16 = vector.load %arg6[%c0_14, %c0_15] : memref<16x128xf32, #tpu.memory_space<vmem>>, vector<16x128xf32>
      tpu.vector_store %arg6[%c0_14, %c0_15], %15 {strides = array<i32>} : memref<16x128xf32, #tpu.memory_space<vmem>>, vector<16x128xf32>,
    } else {
    }
    return
  }
  func.func @transform_0(%arg0: i32, %arg1: i32, %arg2: i32) -> (i32, i32) {
    %c0_i32 = arith.constant 0 : i32
    return %arg0, %arg2 : i32, i32
  }
  func.func @transform_1(%arg0: i32, %arg1: i32, %arg2: i32) -> (i32, i32) {
    %c0_i32 = arith.constant 0 : i32
    return %arg2, %arg1 : i32, i32
  }
  func.func @transform_2(%arg0: i32, %arg1: i32, %arg2: i32) -> (i32, i32) {
    %c0_i32 = arith.constant 0 : i32
    %c0_i32_0 = arith.constant 0 : i32
    return %c0_i32, %arg1 : i32, i32
  }
  func.func @transform_3(%arg0: i32, %arg1: i32, %arg2: i32) -> (i32, i32) {
    %c0_i32 = arith.constant 0 : i32
    return %arg0, %arg1 : i32, i32
  }
}

module attributes {stable_mosaic.version = 11 : i64} {
  func.func @_mha_kernel(%arg0: i32, %arg1: memref<1x8x32xbf16, #tpu.memory_space<vmem>>, %arg2: memref<1x8x64xbf16, #tpu.memory_space<vmem>>, %arg3: memref<8x8xf32, #tpu.memory_space<vmem>>, %arg4: memref<1x8x32xf32, #tpu.memory_space<vmem>>) attributes {dimension_semantics = [#tpu.dimension_semantics<parallel>], iteration_bounds = array<i64: 2>, scalar_prefetch = 0 : i64, scratch_operands = 0 : i64, tpu.core_type = #tpu.core_type<tc>, window_params = [{transform_indices = @transform_0, window_bounds = array<i64: 1, 8, 32>}, {transform_indices = @transform_1, window_bounds = array<i64: 1, 8, 64>}, {pipeline_mode = #tpu.pipeline_mode<synchronous>, transform_indices = @transform_2, window_bounds = array<i64: 8, 8>}, {transform_indices = @transform_3, window_bounds = array<i64: 1, 8, 32>}]} {
    %c0 = arith.constant 0 : index
    %c0_0 = arith.constant 0 : index
    %c0_1 = arith.constant 0 : index
    %0 = vector.load %arg1[%c0, %c0_0, %c0_1] : memref<1x8x32xbf16, #tpu.memory_space<vmem>>, vector<1x8x32xbf16>
    %1 = vector.shape_cast %0 : vector<1x8x32xbf16> to vector<8x32xbf16>
    %c0_2 = arith.constant 0 : index
    %c0_3 = arith.constant 0 : index
    %c0_4 = arith.constant 0 : index
    %2 = vector.load %arg2[%c0_2, %c0_3, %c0_4] : memref<1x8x64xbf16, #tpu.memory_space<vmem>>, vector<1x8x64xbf16>
    %3 = vector.shape_cast %2 : vector<1x8x64xbf16> to vector<8x64xbf16>
    %c0_5 = arith.constant 0 : index
    %c0_6 = arith.constant 0 : index
    %4 = vector.load %arg3[%c0_5, %c0_6] : memref<8x8xf32, #tpu.memory_space<vmem>>, vector<8x8xf32>
    %5 = vector.shape_cast %4 : vector<8x8xf32> to vector<8x8xf32>
    %6 = vector.extract_strided_slice %1 {offsets = [0, 0], sizes = [8, 8], strides = [1, 1]} : vector<8x32xbf16> to vector<8x8xbf16>
    %7 = vector.extract_strided_slice %3 {offsets = [0, 0], sizes = [8, 8], strides = [1, 1]} : vector<8x64xbf16> to vector<8x8xbf16>
    %8 = vector.extract_strided_slice %3 {offsets = [0, 32], sizes = [8, 8], strides = [1, 1]} : vector<8x64xbf16> to vector<8x8xbf16>
    %cst = arith.constant dense<0.000000e+00> : vector<8x8xf32>
    %9 = tpu.matmul %6, %7, %cst {dimension_numbers = #tpu.dot_dimension_numbers<[1], [1], [0], [0], [0, 0, 1, 0], [], []>} : vector<8x8xbf16>, vector<8x8xbf16>, vector<8x8xf32> -> vector<8x8xf32>
    %10 = arith.addf %9, %5 : vector<8x8xf32>
    %cst_7 = arith.constant dense<0xFF800000> : vector<8xf32>
    %11 = vector.multi_reduction <maximumf>, %10, %cst_7 [1] : vector<8x8xf32> to vector<8xf32>
    %12 = vector.shape_cast %11 : vector<8xf32> to vector<8x1xf32>
    %13 = vector.broadcast %12 : vector<8x1xf32> to vector<8x8xf32>
    %14 = arith.subf %10, %13 : vector<8x8xf32>
    %15 = math.exp %14 : vector<8x8xf32>
    %cst_8 = arith.constant dense<0.000000e+00> : vector<8xf32>
    %16 = vector.multi_reduction <add>, %15, %cst_8 [1] : vector<8x8xf32> to vector<8xf32>
    %17 = vector.shape_cast %16 : vector<8xf32> to vector<8x1xf32>
    %18 = tpu.reciprocal %17 {approx = true} : vector<8x1xf32> -> vector<8x1xf32>
    %19 = vector.broadcast %18 : vector<8x1xf32> to vector<8x8xf32>
    %20 = arith.mulf %15, %19 : vector<8x8xf32>
    %21 = arith.truncf %20 : vector<8x8xf32> to vector<8x8xbf16>
    %cst_9 = arith.constant dense<0.000000e+00> : vector<8x8xf32>
    %22 = tpu.matmul %21, %8, %cst_9 {dimension_numbers = #tpu.dot_dimension_numbers<[1], [0], [0], [1], [0, 0, 1, 1], [], []>} : vector<8x8xbf16>, vector<8x8xbf16>, vector<8x8xf32> -> vector<8x8xf32>
    %23 = vector.extract_strided_slice %1 {offsets = [0, 8], sizes = [8, 8], strides = [1, 1]} : vector<8x32xbf16> to vector<8x8xbf16>
    %24 = vector.extract_strided_slice %3 {offsets = [0, 8], sizes = [8, 8], strides = [1, 1]} : vector<8x64xbf16> to vector<8x8xbf16>
    %25 = vector.extract_strided_slice %3 {offsets = [0, 40], sizes = [8, 8], strides = [1, 1]} : vector<8x64xbf16> to vector<8x8xbf16>
    %cst_10 = arith.constant dense<0.000000e+00> : vector<8x8xf32>
    %26 = tpu.matmul %23, %24, %cst_10 {dimension_numbers = #tpu.dot_dimension_numbers<[1], [1], [0], [0], [0, 0, 1, 0], [], []>} : vector<8x8xbf16>, vector<8x8xbf16>, vector<8x8xf32> -> vector<8x8xf32>
    %27 = arith.addf %26, %5 : vector<8x8xf32>
    %cst_11 = arith.constant dense<0xFF800000> : vector<8xf32>
    %28 = vector.multi_reduction <maximumf>, %27, %cst_11 [1] : vector<8x8xf32> to vector<8xf32>
    %29 = vector.shape_cast %28 : vector<8xf32> to vector<8x1xf32>
    %30 = vector.broadcast %29 : vector<8x1xf32> to vector<8x8xf32>
    %31 = arith.subf %27, %30 : vector<8x8xf32>
    %32 = math.exp %31 : vector<8x8xf32>
    %cst_12 = arith.constant dense<0.000000e+00> : vector<8xf32>
    %33 = vector.multi_reduction <add>, %32, %cst_12 [1] : vector<8x8xf32> to vector<8xf32>
    %34 = vector.shape_cast %33 : vector<8xf32> to vector<8x1xf32>
    %35 = tpu.reciprocal %34 {approx = true} : vector<8x1xf32> -> vector<8x1xf32>
    %36 = vector.broadcast %35 : vector<8x1xf32> to vector<8x8xf32>
    %37 = arith.mulf %32, %36 : vector<8x8xf32>
    %38 = arith.truncf %37 : vector<8x8xf32> to vector<8x8xbf16>
    %cst_13 = arith.constant dense<0.000000e+00> : vector<8x8xf32>
    %39 = tpu.matmul %38, %25, %cst_13 {dimension_numbers = #tpu.dot_dimension_numbers<[1], [0], [0], [1], [0, 0, 1, 1], [], []>} : vector<8x8xbf16>, vector<8x8xbf16>, vector<8x8xf32> -> vector<8x8xf32>
    %40 = vector.extract_strided_slice %1 {offsets = [0, 16], sizes = [8, 8], strides = [1, 1]} : vector<8x32xbf16> to vector<8x8xbf16>
    %41 = vector.extract_strided_slice %3 {offsets = [0, 16], sizes = [8, 8], strides = [1, 1]} : vector<8x64xbf16> to vector<8x8xbf16>
    %42 = vector.extract_strided_slice %3 {offsets = [0, 48], sizes = [8, 8], strides = [1, 1]} : vector<8x64xbf16> to vector<8x8xbf16>
    %cst_14 = arith.constant dense<0.000000e+00> : vector<8x8xf32>
    %43 = tpu.matmul %40, %41, %cst_14 {dimension_numbers = #tpu.dot_dimension_numbers<[1], [1], [0], [0], [0, 0, 1, 0], [], []>} : vector<8x8xbf16>, vector<8x8xbf16>, vector<8x8xf32> -> vector<8x8xf32>
    %44 = arith.addf %43, %5 : vector<8x8xf32>
    %cst_15 = arith.constant dense<0xFF800000> : vector<8xf32>
    %45 = vector.multi_reduction <maximumf>, %44, %cst_15 [1] : vector<8x8xf32> to vector<8xf32>
    %46 = vector.shape_cast %45 : vector<8xf32> to vector<8x1xf32>
    %47 = vector.broadcast %46 : vector<8x1xf32> to vector<8x8xf32>
    %48 = arith.subf %44, %47 : vector<8x8xf32>
    %49 = math.exp %48 : vector<8x8xf32>
    %cst_16 = arith.constant dense<0.000000e+00> : vector<8xf32>
    %50 = vector.multi_reduction <add>, %49, %cst_16 [1] : vector<8x8xf32> to vector<8xf32>
    %51 = vector.shape_cast %50 : vector<8xf32> to vector<8x1xf32>
    %52 = tpu.reciprocal %51 {approx = true} : vector<8x1xf32> -> vector<8x1xf32>
    %53 = vector.broadcast %52 : vector<8x1xf32> to vector<8x8xf32>
    %54 = arith.mulf %49, %53 : vector<8x8xf32>
    %55 = arith.truncf %54 : vector<8x8xf32> to vector<8x8xbf16>
    %cst_17 = arith.constant dense<0.000000e+00> : vector<8x8xf32>
    %56 = tpu.matmul %55, %42, %cst_17 {dimension_numbers = #tpu.dot_dimension_numbers<[1], [0], [0], [1], [0, 0, 1, 1], [], []>} : vector<8x8xbf16>, vector<8x8xbf16>, vector<8x8xf32> -> vector<8x8xf32>
    %57 = vector.extract_strided_slice %1 {offsets = [0, 24], sizes = [8, 8], strides = [1, 1]} : vector<8x32xbf16> to vector<8x8xbf16>
    %58 = vector.extract_strided_slice %3 {offsets = [0, 24], sizes = [8, 8], strides = [1, 1]} : vector<8x64xbf16> to vector<8x8xbf16>
    %59 = vector.extract_strided_slice %3 {offsets = [0, 56], sizes = [8, 8], strides = [1, 1]} : vector<8x64xbf16> to vector<8x8xbf16>
    %cst_18 = arith.constant dense<0.000000e+00> : vector<8x8xf32>
    %60 = tpu.matmul %57, %58, %cst_18 {dimension_numbers = #tpu.dot_dimension_numbers<[1], [1], [0], [0], [0, 0, 1, 0], [], []>} : vector<8x8xbf16>, vector<8x8xbf16>, vector<8x8xf32> -> vector<8x8xf32>
    %61 = arith.addf %60, %5 : vector<8x8xf32>
    %cst_19 = arith.constant dense<0xFF800000> : vector<8xf32>
    %62 = vector.multi_reduction <maximumf>, %61, %cst_19 [1] : vector<8x8xf32> to vector<8xf32>
    %63 = vector.shape_cast %62 : vector<8xf32> to vector<8x1xf32>
    %64 = vector.broadcast %63 : vector<8x1xf32> to vector<8x8xf32>
    %65 = arith.subf %61, %64 : vector<8x8xf32>
    %66 = math.exp %65 : vector<8x8xf32>
    %cst_20 = arith.constant dense<0.000000e+00> : vector<8xf32>
    %67 = vector.multi_reduction <add>, %66, %cst_20 [1] : vector<8x8xf32> to vector<8xf32>
    %68 = vector.shape_cast %67 : vector<8xf32> to vector<8x1xf32>
    %69 = tpu.reciprocal %68 {approx = true} : vector<8x1xf32> -> vector<8x1xf32>
    %70 = vector.broadcast %69 : vector<8x1xf32> to vector<8x8xf32>
    %71 = arith.mulf %66, %70 : vector<8x8xf32>
    %72 = arith.truncf %71 : vector<8x8xf32> to vector<8x8xbf16>
    %cst_21 = arith.constant dense<0.000000e+00> : vector<8x8xf32>
    %73 = tpu.matmul %72, %59, %cst_21 {dimension_numbers = #tpu.dot_dimension_numbers<[1], [0], [0], [1], [0, 0, 1, 1], [], []>} : vector<8x8xbf16>, vector<8x8xbf16>, vector<8x8xf32> -> vector<8x8xf32>
    %74 = tpu.concatenate %22, %39, %56, %73 in 1 : vector<8x8xf32>, vector<8x8xf32>, vector<8x8xf32>, vector<8x8xf32> -> vector<8x32xf32>
    %c0_22 = arith.constant 0 : index
    %c0_23 = arith.constant 0 : index
    %c0_24 = arith.constant 0 : index
    %75 = vector.load %arg4[%c0_22, %c0_23, %c0_24] : memref<1x8x32xf32, #tpu.memory_space<vmem>>, vector<1x8x32xf32>
    %76 = vector.shape_cast %75 : vector<1x8x32xf32> to vector<8x32xf32>
    %77 = vector.shape_cast %74 : vector<8x32xf32> to vector<1x8x32xf32>
    tpu.vector_store %arg4[%c0_22, %c0_23, %c0_24], %77 {strides = array<i32>} : memref<1x8x32xf32, #tpu.memory_space<vmem>>, vector<1x8x32xf32>,
    return
  }
  func.func @transform_0(%arg0: i32) -> (i32, i32, i32) {
    %c0_i32 = arith.constant 0 : i32
    %c0_i32_0 = arith.constant 0 : i32
    %c0_i32_1 = arith.constant 0 : i32
    return %arg0, %c0_i32, %c0_i32_0 : i32, i32, i32
  }
  func.func @transform_1(%arg0: i32) -> (i32, i32, i32) {
    %c0_i32 = arith.constant 0 : i32
    %c0_i32_0 = arith.constant 0 : i32
    %c0_i32_1 = arith.constant 0 : i32
    return %arg0, %c0_i32, %c0_i32_0 : i32, i32, i32
  }
  func.func @transform_2(%arg0: i32) -> (i32, i32) {
    %c0_i32 = arith.constant 0 : i32
    %c0_i32_0 = arith.constant 0 : i32
    %c0_i32_1 = arith.constant 0 : i32
    return %c0_i32, %c0_i32_0 : i32, i32
  }
  func.func @transform_3(%arg0: i32) -> (i32, i32, i32) {
    %c0_i32 = arith.constant 0 : i32
    %c0_i32_0 = arith.constant 0 : i32
    %c0_i32_1 = arith.constant 0 : i32
    return %arg0, %c0_i32, %c0_i32_0 : i32, i32, i32
  }
}

module attributes {stable_mosaic.version = 11 : i64} {
  func.func @_matmul_res_ln_kernel(%arg0: i32, %arg1: i32, %arg2: memref<16x128xbf16, #tpu.memory_space<vmem>>, %arg3: memref<128x32xbf16, #tpu.memory_space<vmem>>, %arg4: memref<1x32xf32, #tpu.memory_space<vmem>>, %arg5: memref<16x32xf32, #tpu.memory_space<vmem>>, %arg6: memref<1x32xf32, #tpu.memory_space<vmem>>, %arg7: memref<1x32xf32, #tpu.memory_space<vmem>>, %arg8: memref<16x32xf32, #tpu.memory_space<vmem>>, %arg9: memref<16x32xf32, #tpu.memory_space<vmem>>) attributes {dimension_semantics = [#tpu.dimension_semantics<parallel>, #tpu.dimension_semantics<arbitrary>], iteration_bounds = array<i64: 1, 1>, scalar_prefetch = 0 : i64, scratch_operands = 1 : i64, tpu.core_type = #tpu.core_type<tc>, window_params = [{transform_indices = @transform_0, window_bounds = array<i64: 16, 128>}, {transform_indices = @transform_1, window_bounds = array<i64: 128, 32>}, {pipeline_mode = #tpu.pipeline_mode<synchronous>, transform_indices = @transform_2, window_bounds = array<i64: 1, 32>}, {transform_indices = @transform_3, window_bounds = array<i64: 16, 32>}, {pipeline_mode = #tpu.pipeline_mode<synchronous>, transform_indices = @transform_4, window_bounds = array<i64: 1, 32>}, {pipeline_mode = #tpu.pipeline_mode<synchronous>, transform_indices = @transform_5, window_bounds = array<i64: 1, 32>}, {transform_indices = @transform_6, window_bounds = array<i64: 16, 32>}]} {
    %c0_i32 = arith.constant 0 : i32
    %0 = arith.cmpi eq, %arg1, %c0_i32 : i32
    %1 = arith.extui %0 : i1 to i32
    %c0_i32_0 = arith.constant 0 : i32
    %2 = arith.cmpi ne, %1, %c0_i32_0 : i32
    scf.if %2 {
      %cst_10 = arith.constant 0.000000e+00 : f32
      %12 = vector.broadcast %cst_10 : f32 to vector<16x32xf32>
      %c0_11 = arith.constant 0 : index
      %c0_12 = arith.constant 0 : index
      %13 = vector.load %arg9[%c0_11, %c0_12] : memref<16x32xf32, #tpu.memory_space<vmem>>, vector<16x32xf32>
      tpu.vector_store %arg9[%c0_11, %c0_12], %12 {strides = array<i32>} : memref<16x32xf32, #tpu.memory_space<vmem>>, vector<16x32xf32>,
    } else {
    }
    %c0 = arith.constant 0 : index
    %c0_1 = arith.constant 0 : index
    %3 = vector.load %arg9[%c0, %c0_1] : memref<16x32xf32, #tpu.memory_space<vmem>>, vector<16x32xf32>
    %c0_2 = arith.constant 0 : index
    %c0_3 = arith.constant 0 : index
    %4 = vector.load %arg2[%c0_2, %c0_3] : memref<16x128xbf16, #tpu.memory_space<vmem>>, vector<16x128xbf16>
    %c0_4 = arith.constant 0 : index
    %c0_5 = arith.constant 0 : index
    %5 = vector.load %arg3[%c0_4, %c0_5] : memref<128x32xbf16, #tpu.memory_space<vmem>>, vector<128x32xbf16>
    %cst = arith.constant dense<0.000000e+00> : vector<16x32xf32>
    %6 = tpu.matmul %4, %5, %cst {dimension_numbers = #tpu.dot_dimension_numbers<[1], [0], [0], [1], [0, 0, 1, 1], [], []>} : vector<16x128xbf16>, vector<128x32xbf16>, vector<16x32xf32> -> vector<16x32xf32>
    %7 = arith.addf %3, %6 : vector<16x32xf32>
    %c0_6 = arith.constant 0 : index
    %c0_7 = arith.constant 0 : index
    %8 = vector.load %arg9[%c0_6, %c0_7] : memref<16x32xf32, #tpu.memory_space<vmem>>, vector<16x32xf32>
    tpu.vector_store %arg9[%c0_6, %c0_7], %7 {strides = array<i32>} : memref<16x32xf32, #tpu.memory_space<vmem>>, vector<16x32xf32>,
    %c0_i32_8 = arith.constant 0 : i32
    %9 = arith.cmpi eq, %arg1, %c0_i32_8 : i32
    %10 = arith.extui %9 : i1 to i32
    %c0_i32_9 = arith.constant 0 : i32
    %11 = arith.cmpi ne, %10, %c0_i32_9 : i32
    scf.if %11 {
      %c0_10 = arith.constant 0 : index
      %c0_11 = arith.constant 0 : index
      %12 = vector.load %arg9[%c0_10, %c0_11] : memref<16x32xf32, #tpu.memory_space<vmem>>, vector<16x32xf32>
      %c0_12 = arith.constant 0 : index
      %c0_13 = arith.constant 0 : index
      %13 = vector.load %arg4[%c0_12, %c0_13] : memref<1x32xf32, #tpu.memory_space<vmem>>, vector<1x32xf32>
      %14 = vector.broadcast %13 : vector<1x32xf32> to vector<16x32xf32>
      %15 = arith.addf %12, %14 : vector<16x32xf32>
      %c0_14 = arith.constant 0 : index
      %c0_15 = arith.constant 0 : index
      %16 = vector.load %arg5[%c0_14, %c0_15] : memref<16x32xf32, #tpu.memory_space<vmem>>, vector<16x32xf32>
      %17 = arith.addf %15, %16 : vector<16x32xf32>
      %cst_16 = arith.constant dense<0.000000e+00> : vector<16xf32>
      %18 = vector.multi_reduction <add>, %17, %cst_16 [1] : vector<16x32xf32> to vector<16xf32>
      %19 = vector.shape_cast %18 : vector<16xf32> to vector<16x1xf32>
      %cst_17 = arith.constant 3.200000e+01 : f32
      %20 = vector.broadcast %cst_17 : f32 to vector<16x1xf32>
      %21 = arith.divf %19, %20 : vector<16x1xf32>
      %22 = vector.broadcast %21 : vector<16x1xf32> to vector<16x32xf32>
      %23 = arith.subf %17, %22 : vector<16x32xf32>
      %24 = arith.mulf %23, %23 : vector<16x32xf32>
      %cst_18 = arith.constant dense<0.000000e+00> : vector<16xf32>
      %25 = vector.multi_reduction <add>, %24, %cst_18 [1] : vector<16x32xf32> to vector<16xf32>
      %26 = vector.shape_cast %25 : vector<16xf32> to vector<16x1xf32>
      %cst_19 = arith.constant 3.200000e+01 : f32
      %27 = vector.broadcast %cst_19 : f32 to vector<16x1xf32>
      %28 = arith.divf %26, %27 : vector<16x1xf32>
      %29 = vector.broadcast %21 : vector<16x1xf32> to vector<16x32xf32>
      %30 = arith.subf %17, %29 : vector<16x32xf32>
      %cst_20 = arith.constant 9.99999974E-6 : f32
      %31 = vector.broadcast %cst_20 : f32 to vector<16x1xf32>
      %32 = arith.addf %28, %31 : vector<16x1xf32>
      %33 = math.rsqrt %32 : vector<16x1xf32>
      %34 = vector.broadcast %33 : vector<16x1xf32> to vector<16x32xf32>
      %35 = arith.mulf %30, %34 : vector<16x32xf32>
      %c0_21 = arith.constant 0 : index
      %c0_22 = arith.constant 0 : index
      %36 = vector.load %arg6[%c0_21, %c0_22] : memref<1x32xf32, #tpu.memory_space<vmem>>, vector<1x32xf32>
      %37 = vector.broadcast %36 : vector<1x32xf32> to vector<16x32xf32>
      %38 = arith.mulf %35, %37 : vector<16x32xf32>
      %c0_23 = arith.constant 0 : index
      %c0_24 = arith.constant 0 : index
      %39 = vector.load %arg7[%c0_23, %c0_24] : memref<1x32xf32, #tpu.memory_space<vmem>>, vector<1x32xf32>
      %40 = vector.broadcast %39 : vector<1x32xf32> to vector<16x32xf32>
      %41 = arith.addf %38, %40 : vector<16x32xf32>
      %c0_25 = arith.constant 0 : index
      %c0_26 = arith.constant 0 : index
      %42 = vector.load %arg8[%c0_25, %c0_26] : memref<16x32xf32, #tpu.memory_space<vmem>>, vector<16x32xf32>
      tpu.vector_store %arg8[%c0_25, %c0_26], %41 {strides = array<i32>} : memref<16x32xf32, #tpu.memory_space<vmem>>, vector<16x32xf32>,
    } else {
    }
    return
  }
  func.func @transform_0(%arg0: i32, %arg1: i32) -> (i32, i32) {
    %c0_i32 = arith.constant 0 : i32
    return %arg0, %arg1 : i32, i32
  }
  func.func @transform_1(%arg0: i32, %arg1: i32) -> (i32, i32) {
    %c0_i32 = arith.constant 0 : i32
    %c0_i32_0 = arith.constant 0 : i32
    return %arg1, %c0_i32 : i32, i32
  }
  func.func @transform_2(%arg0: i32, %arg1: i32) -> (i32, i32) {
    %c0_i32 = arith.constant 0 : i32
    %c0_i32_0 = arith.constant 0 : i32
    %c0_i32_1 = arith.constant 0 : i32
    return %c0_i32, %c0_i32_0 : i32, i32
  }
  func.func @transform_3(%arg0: i32, %arg1: i32) -> (i32, i32) {
    %c0_i32 = arith.constant 0 : i32
    %c0_i32_0 = arith.constant 0 : i32
    return %arg0, %c0_i32 : i32, i32
  }
  func.func @transform_4(%arg0: i32, %arg1: i32) -> (i32, i32) {
    %c0_i32 = arith.constant 0 : i32
    %c0_i32_0 = arith.constant 0 : i32
    %c0_i32_1 = arith.constant 0 : i32
    return %c0_i32, %c0_i32_0 : i32, i32
  }
  func.func @transform_5(%arg0: i32, %arg1: i32) -> (i32, i32) {
    %c0_i32 = arith.constant 0 : i32
    %c0_i32_0 = arith.constant 0 : i32
    %c0_i32_1 = arith.constant 0 : i32
    return %c0_i32, %c0_i32_0 : i32, i32
  }
  func.func @transform_6(%arg0: i32, %arg1: i32) -> (i32, i32) {
    %c0_i32 = arith.constant 0 : i32
    %c0_i32_0 = arith.constant 0 : i32
    return %arg0, %c0_i32 : i32, i32
  }
}

module attributes {stable_mosaic.version = 11 : i64} {
  func.func @_matmul_kernel(%arg0: i32, %arg1: i32, %arg2: i32, %arg3: memref<16x128xbf16, #tpu.memory_space<vmem>>, %arg4: memref<128x128xbf16, #tpu.memory_space<vmem>>, %arg5: memref<1x128xf32, #tpu.memory_space<vmem>>, %arg6: memref<16x128xf32, #tpu.memory_space<vmem>>, %arg7: memref<16x128xf32, #tpu.memory_space<vmem>>) attributes {dimension_semantics = [#tpu.dimension_semantics<parallel>, #tpu.dimension_semantics<parallel>, #tpu.dimension_semantics<arbitrary>], iteration_bounds = array<i64: 1, 1, 1>, scalar_prefetch = 0 : i64, scratch_operands = 1 : i64, tpu.core_type = #tpu.core_type<tc>, window_params = [{transform_indices = @transform_0, window_bounds = array<i64: 16, 128>}, {transform_indices = @transform_1, window_bounds = array<i64: 128, 128>}, {transform_indices = @transform_2, window_bounds = array<i64: 1, 128>}, {transform_indices = @transform_3, window_bounds = array<i64: 16, 128>}]} {
    %c0_i32 = arith.constant 0 : i32
    %0 = arith.cmpi eq, %arg2, %c0_i32 : i32
    %1 = arith.extui %0 : i1 to i32
    %c0_i32_0 = arith.constant 0 : i32
    %2 = arith.cmpi ne, %1, %c0_i32_0 : i32
    scf.if %2 {
      %cst_10 = arith.constant 0.000000e+00 : f32
      %12 = vector.broadcast %cst_10 : f32 to vector<16x128xf32>
      %c0_11 = arith.constant 0 : index
      %c0_12 = arith.constant 0 : index
      %13 = vector.load %arg7[%c0_11, %c0_12] : memref<16x128xf32, #tpu.memory_space<vmem>>, vector<16x128xf32>
      tpu.vector_store %arg7[%c0_11, %c0_12], %12 {strides = array<i32>} : memref<16x128xf32, #tpu.memory_space<vmem>>, vector<16x128xf32>,
    } else {
    }
    %c0 = arith.constant 0 : index
    %c0_1 = arith.constant 0 : index
    %3 = vector.load %arg7[%c0, %c0_1] : memref<16x128xf32, #tpu.memory_space<vmem>>, vector<16x128xf32>
    %c0_2 = arith.constant 0 : index
    %c0_3 = arith.constant 0 : index
    %4 = vector.load %arg3[%c0_2, %c0_3] : memref<16x128xbf16, #tpu.memory_space<vmem>>, vector<16x128xbf16>
    %c0_4 = arith.constant 0 : index
    %c0_5 = arith.constant 0 : index
    %5 = vector.load %arg4[%c0_4, %c0_5] : memref<128x128xbf16, #tpu.memory_space<vmem>>, vector<128x128xbf16>
    %cst = arith.constant dense<0.000000e+00> : vector<16x128xf32>
    %6 = tpu.matmul %4, %5, %cst {dimension_numbers = #tpu.dot_dimension_numbers<[1], [0], [0], [1], [0, 0, 1, 1], [], []>} : vector<16x128xbf16>, vector<128x128xbf16>, vector<16x128xf32> -> vector<16x128xf32>
    %7 = arith.addf %3, %6 : vector<16x128xf32>
    %c0_6 = arith.constant 0 : index
    %c0_7 = arith.constant 0 : index
    %8 = vector.load %arg7[%c0_6, %c0_7] : memref<16x128xf32, #tpu.memory_space<vmem>>, vector<16x128xf32>
    tpu.vector_store %arg7[%c0_6, %c0_7], %7 {strides = array<i32>} : memref<16x128xf32, #tpu.memory_space<vmem>>, vector<16x128xf32>,
    %c0_i32_8 = arith.constant 0 : i32
    %9 = arith.cmpi eq, %arg2, %c0_i32_8 : i32
    %10 = arith.extui %9 : i1 to i32
    %c0_i32_9 = arith.constant 0 : i32
    %11 = arith.cmpi ne, %10, %c0_i32_9 : i32
    scf.if %11 {
      %c0_10 = arith.constant 0 : index
      %c0_11 = arith.constant 0 : index
      %12 = vector.load %arg7[%c0_10, %c0_11] : memref<16x128xf32, #tpu.memory_space<vmem>>, vector<16x128xf32>
      %c0_12 = arith.constant 0 : index
      %c0_13 = arith.constant 0 : index
      %13 = vector.load %arg5[%c0_12, %c0_13] : memref<1x128xf32, #tpu.memory_space<vmem>>, vector<1x128xf32>
      %14 = vector.broadcast %13 : vector<1x128xf32> to vector<16x128xf32>
      %15 = arith.addf %12, %14 : vector<16x128xf32>
      %cst_14 = arith.constant 0.000000e+00 : f32
      %16 = vector.broadcast %cst_14 : f32 to vector<16x128xf32>
      %17 = arith.maximumf %15, %16 : vector<16x128xf32>
      %c0_15 = arith.constant 0 : index
      %c0_16 = arith.constant 0 : index
      %18 = vector.load %arg6[%c0_15, %c0_16] : memref<16x128xf32, #tpu.memory_space<vmem>>, vector<16x128xf32>
      tpu.vector_store %arg6[%c0_15, %c0_16], %17 {strides = array<i32>} : memref<16x128xf32, #tpu.memory_space<vmem>>, vector<16x128xf32>,
    } else {
    }
    return
  }
  func.func @transform_0(%arg0: i32, %arg1: i32, %arg2: i32) -> (i32, i32) {
    %c0_i32 = arith.constant 0 : i32
    return %arg0, %arg2 : i32, i32
  }
  func.func @transform_1(%arg0: i32, %arg1: i32, %arg2: i32) -> (i32, i32) {
    %c0_i32 = arith.constant 0 : i32
    return %arg2, %arg1 : i32, i32
  }
  func.func @transform_2(%arg0: i32, %arg1: i32, %arg2: i32) -> (i32, i32) {
    %c0_i32 = arith.constant 0 : i32
    %c0_i32_0 = arith.constant 0 : i32
    return %c0_i32, %arg1 : i32, i32
  }
  func.func @transform_3(%arg0: i32, %arg1: i32, %arg2: i32) -> (i32, i32) {
    %c0_i32 = arith.constant 0 : i32
    return %arg0, %arg1 : i32, i32
  }
}

module attributes {stable_mosaic.version = 11 : i64} {
  func.func @_layernorm_kernel(%arg0: i32, %arg1: memref<16x32xf32, #tpu.memory_space<vmem>>, %arg2: memref<1x32xf32, #tpu.memory_space<vmem>>, %arg3: memref<1x32xf32, #tpu.memory_space<vmem>>, %arg4: memref<16x32xf32, #tpu.memory_space<vmem>>) attributes {dimension_semantics = [#tpu.dimension_semantics<parallel>], iteration_bounds = array<i64: 1>, scalar_prefetch = 0 : i64, scratch_operands = 0 : i64, tpu.core_type = #tpu.core_type<tc>, window_params = [{transform_indices = @transform_0, window_bounds = array<i64: 16, 32>}, {pipeline_mode = #tpu.pipeline_mode<synchronous>, transform_indices = @transform_1, window_bounds = array<i64: 1, 32>}, {pipeline_mode = #tpu.pipeline_mode<synchronous>, transform_indices = @transform_2, window_bounds = array<i64: 1, 32>}, {transform_indices = @transform_3, window_bounds = array<i64: 16, 32>}]} {
    %c0 = arith.constant 0 : index
    %c0_0 = arith.constant 0 : index
    %0 = vector.load %arg1[%c0, %c0_0] : memref<16x32xf32, #tpu.memory_space<vmem>>, vector<16x32xf32>
    %cst = arith.constant dense<0.000000e+00> : vector<16xf32>
    %1 = vector.multi_reduction <add>, %0, %cst [1] : vector<16x32xf32> to vector<16xf32>
    %2 = vector.shape_cast %1 : vector<16xf32> to vector<16x1xf32>
    %cst_1 = arith.constant 3.200000e+01 : f32
    %3 = vector.broadcast %cst_1 : f32 to vector<16x1xf32>
    %4 = arith.divf %2, %3 : vector<16x1xf32>
    %5 = vector.broadcast %4 : vector<16x1xf32> to vector<16x32xf32>
    %6 = arith.subf %0, %5 : vector<16x32xf32>
    %7 = arith.mulf %6, %6 : vector<16x32xf32>
    %cst_2 = arith.constant dense<0.000000e+00> : vector<16xf32>
    %8 = vector.multi_reduction <add>, %7, %cst_2 [1] : vector<16x32xf32> to vector<16xf32>
    %9 = vector.shape_cast %8 : vector<16xf32> to vector<16x1xf32>
    %cst_3 = arith.constant 3.200000e+01 : f32
    %10 = vector.broadcast %cst_3 : f32 to vector<16x1xf32>
    %11 = arith.divf %9, %10 : vector<16x1xf32>
    %12 = vector.broadcast %4 : vector<16x1xf32> to vector<16x32xf32>
    %13 = arith.subf %0, %12 : vector<16x32xf32>
    %cst_4 = arith.constant 9.99999974E-6 : f32
    %14 = vector.broadcast %cst_4 : f32 to vector<16x1xf32>
    %15 = arith.addf %11, %14 : vector<16x1xf32>
    %16 = math.rsqrt %15 : vector<16x1xf32>
    %17 = vector.broadcast %16 : vector<16x1xf32> to vector<16x32xf32>
    %18 = arith.mulf %13, %17 : vector<16x32xf32>
    %c0_5 = arith.constant 0 : index
    %c0_6 = arith.constant 0 : index
    %19 = vector.load %arg2[%c0_5, %c0_6] : memref<1x32xf32, #tpu.memory_space<vmem>>, vector<1x32xf32>
    %20 = vector.broadcast %19 : vector<1x32xf32> to vector<16x32xf32>
    %21 = arith.mulf %18, %20 : vector<16x32xf32>
    %c0_7 = arith.constant 0 : index
    %c0_8 = arith.constant 0 : index
    %22 = vector.load %arg3[%c0_7, %c0_8] : memref<1x32xf32, #tpu.memory_space<vmem>>, vector<1x32xf32>
    %23 = vector.broadcast %22 : vector<1x32xf32> to vector<16x32xf32>
    %24 = arith.addf %21, %23 : vector<16x32xf32>
    %c0_9 = arith.constant 0 : index
    %c0_10 = arith.constant 0 : index
    %25 = vector.load %arg4[%c0_9, %c0_10] : memref<16x32xf32, #tpu.memory_space<vmem>>, vector<16x32xf32>
    tpu.vector_store %arg4[%c0_9, %c0_10], %24 {strides = array<i32>} : memref<16x32xf32, #tpu.memory_space<vmem>>, vector<16x32xf32>,
    return
  }
  func.func @transform_0(%arg0: i32) -> (i32, i32) {
    %c0_i32 = arith.constant 0 : i32
    %c0_i32_0 = arith.constant 0 : i32
    return %arg0, %c0_i32 : i32, i32
  }
  func.func @transform_1(%arg0: i32) -> (i32, i32) {
    %c0_i32 = arith.constant 0 : i32
    %c0_i32_0 = arith.constant 0 : i32
    %c0_i32_1 = arith.constant 0 : i32
    return %c0_i32, %c0_i32_0 : i32, i32
  }
  func.func @transform_2(%arg0: i32) -> (i32, i32) {
    %c0_i32 = arith.constant 0 : i32
    %c0_i32_0 = arith.constant 0 : i32
    %c0_i32_1 = arith.constant 0 : i32
    return %c0_i32, %c0_i32_0 : i32, i32
  }
  func.func @transform_3(%arg0: i32) -> (i32, i32) {
    %c0_i32 = arith.constant 0 : i32
    %c0_i32_0 = arith.constant 0 : i32
    return %arg0, %c0_i32 : i32, i32
  }
}

module attributes {stable_mosaic.version = 11 : i64} {
  func.func @_mha_kernel(%arg0: i32, %arg1: memref<1x8x32xbf16, #tpu.memory_space<vmem>>, %arg2: memref<1x8x64xbf16, #tpu.memory_space<vmem>>, %arg3: memref<8x8xf32, #tpu.memory_space<vmem>>, %arg4: memref<1x8x32xf32, #tpu.memory_space<vmem>>) attributes {dimension_semantics = [#tpu.dimension_semantics<parallel>], iteration_bounds = array<i64: 2>, scalar_prefetch = 0 : i64, scratch_operands = 0 : i64, tpu.core_type = #tpu.core_type<tc>, window_params = [{transform_indices = @transform_0, window_bounds = array<i64: 1, 8, 32>}, {transform_indices = @transform_1, window_bounds = array<i64: 1, 8, 64>}, {pipeline_mode = #tpu.pipeline_mode<synchronous>, transform_indices = @transform_2, window_bounds = array<i64: 8, 8>}, {transform_indices = @transform_3, window_bounds = array<i64: 1, 8, 32>}]} {
    %c0 = arith.constant 0 : index
    %c0_0 = arith.constant 0 : index
    %c0_1 = arith.constant 0 : index
    %0 = vector.load %arg1[%c0, %c0_0, %c0_1] : memref<1x8x32xbf16, #tpu.memory_space<vmem>>, vector<1x8x32xbf16>
    %1 = vector.shape_cast %0 : vector<1x8x32xbf16> to vector<8x32xbf16>
    %c0_2 = arith.constant 0 : index
    %c0_3 = arith.constant 0 : index
    %c0_4 = arith.constant 0 : index
    %2 = vector.load %arg2[%c0_2, %c0_3, %c0_4] : memref<1x8x64xbf16, #tpu.memory_space<vmem>>, vector<1x8x64xbf16>
    %3 = vector.shape_cast %2 : vector<1x8x64xbf16> to vector<8x64xbf16>
    %c0_5 = arith.constant 0 : index
    %c0_6 = arith.constant 0 : index
    %4 = vector.load %arg3[%c0_5, %c0_6] : memref<8x8xf32, #tpu.memory_space<vmem>>, vector<8x8xf32>
    %5 = vector.extract_strided_slice %1 {offsets = [0, 0], sizes = [8, 8], strides = [1, 1]} : vector<8x32xbf16> to vector<8x8xbf16>
    %6 = vector.extract_strided_slice %3 {offsets = [0, 0], sizes = [8, 8], strides = [1, 1]} : vector<8x64xbf16> to vector<8x8xbf16>
    %7 = vector.extract_strided_slice %3 {offsets = [0, 32], sizes = [8, 8], strides = [1, 1]} : vector<8x64xbf16> to vector<8x8xbf16>
    %cst = arith.constant dense<0.000000e+00> : vector<8x8xf32>
    %8 = tpu.matmul %5, %6, %cst {dimension_numbers = #tpu.dot_dimension_numbers<[1], [1], [0], [0], [0, 0, 1, 0], [], []>} : vector<8x8xbf16>, vector<8x8xbf16>, vector<8x8xf32> -> vector<8x8xf32>
    %9 = arith.addf %8, %4 : vector<8x8xf32>
    %cst_7 = arith.constant dense<0xFF800000> : vector<8xf32>
    %10 = vector.multi_reduction <maximumf>, %9, %cst_7 [1] : vector<8x8xf32> to vector<8xf32>
    %11 = vector.shape_cast %10 : vector<8xf32> to vector<8x1xf32>
    %12 = vector.broadcast %11 : vector<8x1xf32> to vector<8x8xf32>
    %13 = arith.subf %9, %12 : vector<8x8xf32>
    %14 = math.exp %13 : vector<8x8xf32>
    %cst_8 = arith.constant dense<0.000000e+00> : vector<8xf32>
    %15 = vector.multi_reduction <add>, %14, %cst_8 [1] : vector<8x8xf32> to vector<8xf32>
    %16 = vector.shape_cast %15 : vector<8xf32> to vector<8x1xf32>
    %17 = tpu.reciprocal %16 {approx = true} : vector<8x1xf32> -> vector<8x1xf32>
    %18 = vector.broadcast %17 : vector<8x1xf32> to vector<8x8xf32>
    %19 = arith.mulf %14, %18 : vector<8x8xf32>
    %20 = arith.truncf %19 : vector<8x8xf32> to vector<8x8xbf16>
    %cst_9 = arith.constant dense<0.000000e+00> : vector<8x8xf32>
    %21 = tpu.matmul %20, %7, %cst_9 {dimension_numbers = #tpu.dot_dimension_numbers<[1], [0], [0], [1], [0, 0, 1, 1], [], []>} : vector<8x8xbf16>, vector<8x8xbf16>, vector<8x8xf32> -> vector<8x8xf32>
    %22 = vector.extract_strided_slice %1 {offsets = [0, 8], sizes = [8, 8], strides = [1, 1]} : vector<8x32xbf16> to vector<8x8xbf16>
    %23 = vector.extract_strided_slice %3 {offsets = [0, 8], sizes = [8, 8], strides = [1, 1]} : vector<8x64xbf16> to vector<8x8xbf16>
    %24 = vector.extract_strided_slice %3 {offsets = [0, 40], sizes = [8, 8], strides = [1, 1]} : vector<8x64xbf16> to vector<8x8xbf16>
    %cst_10 = arith.constant dense<0.000000e+00> : vector<8x8xf32>
    %25 = tpu.matmul %22, %23, %cst_10 {dimension_numbers = #tpu.dot_dimension_numbers<[1], [1], [0], [0], [0, 0, 1, 0], [], []>} : vector<8x8xbf16>, vector<8x8xbf16>, vector<8x8xf32> -> vector<8x8xf32>
    %26 = arith.addf %25, %4 : vector<8x8xf32>
    %cst_11 = arith.constant dense<0xFF800000> : vector<8xf32>
    %27 = vector.multi_reduction <maximumf>, %26, %cst_11 [1] : vector<8x8xf32> to vector<8xf32>
    %28 = vector.shape_cast %27 : vector<8xf32> to vector<8x1xf32>
    %29 = vector.broadcast %28 : vector<8x1xf32> to vector<8x8xf32>
    %30 = arith.subf %26, %29 : vector<8x8xf32>
    %31 = math.exp %30 : vector<8x8xf32>
    %cst_12 = arith.constant dense<0.000000e+00> : vector<8xf32>
    %32 = vector.multi_reduction <add>, %31, %cst_12 [1] : vector<8x8xf32> to vector<8xf32>
    %33 = vector.shape_cast %32 : vector<8xf32> to vector<8x1xf32>
    %34 = tpu.reciprocal %33 {approx = true} : vector<8x1xf32> -> vector<8x1xf32>
    %35 = vector.broadcast %34 : vector<8x1xf32> to vector<8x8xf32>
    %36 = arith.mulf %31, %35 : vector<8x8xf32>
    %37 = arith.truncf %36 : vector<8x8xf32> to vector<8x8xbf16>
    %cst_13 = arith.constant dense<0.000000e+00> : vector<8x8xf32>
    %38 = tpu.matmul %37, %24, %cst_13 {dimension_numbers = #tpu.dot_dimension_numbers<[1], [0], [0], [1], [0, 0, 1, 1], [], []>} : vector<8x8xbf16>, vector<8x8xbf16>, vector<8x8xf32> -> vector<8x8xf32>
    %39 = vector.extract_strided_slice %1 {offsets = [0, 16], sizes = [8, 8], strides = [1, 1]} : vector<8x32xbf16> to vector<8x8xbf16>
    %40 = vector.extract_strided_slice %3 {offsets = [0, 16], sizes = [8, 8], strides = [1, 1]} : vector<8x64xbf16> to vector<8x8xbf16>
    %41 = vector.extract_strided_slice %3 {offsets = [0, 48], sizes = [8, 8], strides = [1, 1]} : vector<8x64xbf16> to vector<8x8xbf16>
    %cst_14 = arith.constant dense<0.000000e+00> : vector<8x8xf32>
    %42 = tpu.matmul %39, %40, %cst_14 {dimension_numbers = #tpu.dot_dimension_numbers<[1], [1], [0], [0], [0, 0, 1, 0], [], []>} : vector<8x8xbf16>, vector<8x8xbf16>, vector<8x8xf32> -> vector<8x8xf32>
    %43 = arith.addf %42, %4 : vector<8x8xf32>
    %cst_15 = arith.constant dense<0xFF800000> : vector<8xf32>
    %44 = vector.multi_reduction <maximumf>, %43, %cst_15 [1] : vector<8x8xf32> to vector<8xf32>
    %45 = vector.shape_cast %44 : vector<8xf32> to vector<8x1xf32>
    %46 = vector.broadcast %45 : vector<8x1xf32> to vector<8x8xf32>
    %47 = arith.subf %43, %46 : vector<8x8xf32>
    %48 = math.exp %47 : vector<8x8xf32>
    %cst_16 = arith.constant dense<0.000000e+00> : vector<8xf32>
    %49 = vector.multi_reduction <add>, %48, %cst_16 [1] : vector<8x8xf32> to vector<8xf32>
    %50 = vector.shape_cast %49 : vector<8xf32> to vector<8x1xf32>
    %51 = tpu.reciprocal %50 {approx = true} : vector<8x1xf32> -> vector<8x1xf32>
    %52 = vector.broadcast %51 : vector<8x1xf32> to vector<8x8xf32>
    %53 = arith.mulf %48, %52 : vector<8x8xf32>
    %54 = arith.truncf %53 : vector<8x8xf32> to vector<8x8xbf16>
    %cst_17 = arith.constant dense<0.000000e+00> : vector<8x8xf32>
    %55 = tpu.matmul %54, %41, %cst_17 {dimension_numbers = #tpu.dot_dimension_numbers<[1], [0], [0], [1], [0, 0, 1, 1], [], []>} : vector<8x8xbf16>, vector<8x8xbf16>, vector<8x8xf32> -> vector<8x8xf32>
    %56 = vector.extract_strided_slice %1 {offsets = [0, 24], sizes = [8, 8], strides = [1, 1]} : vector<8x32xbf16> to vector<8x8xbf16>
    %57 = vector.extract_strided_slice %3 {offsets = [0, 24], sizes = [8, 8], strides = [1, 1]} : vector<8x64xbf16> to vector<8x8xbf16>
    %58 = vector.extract_strided_slice %3 {offsets = [0, 56], sizes = [8, 8], strides = [1, 1]} : vector<8x64xbf16> to vector<8x8xbf16>
    %cst_18 = arith.constant dense<0.000000e+00> : vector<8x8xf32>
    %59 = tpu.matmul %56, %57, %cst_18 {dimension_numbers = #tpu.dot_dimension_numbers<[1], [1], [0], [0], [0, 0, 1, 0], [], []>} : vector<8x8xbf16>, vector<8x8xbf16>, vector<8x8xf32> -> vector<8x8xf32>
    %60 = arith.addf %59, %4 : vector<8x8xf32>
    %cst_19 = arith.constant dense<0xFF800000> : vector<8xf32>
    %61 = vector.multi_reduction <maximumf>, %60, %cst_19 [1] : vector<8x8xf32> to vector<8xf32>
    %62 = vector.shape_cast %61 : vector<8xf32> to vector<8x1xf32>
    %63 = vector.broadcast %62 : vector<8x1xf32> to vector<8x8xf32>
    %64 = arith.subf %60, %63 : vector<8x8xf32>
    %65 = math.exp %64 : vector<8x8xf32>
    %cst_20 = arith.constant dense<0.000000e+00> : vector<8xf32>
    %66 = vector.multi_reduction <add>, %65, %cst_20 [1] : vector<8x8xf32> to vector<8xf32>
    %67 = vector.shape_cast %66 : vector<8xf32> to vector<8x1xf32>
    %68 = tpu.reciprocal %67 {approx = true} : vector<8x1xf32> -> vector<8x1xf32>
    %69 = vector.broadcast %68 : vector<8x1xf32> to vector<8x8xf32>
    %70 = arith.mulf %65, %69 : vector<8x8xf32>
    %71 = arith.truncf %70 : vector<8x8xf32> to vector<8x8xbf16>
    %cst_21 = arith.constant dense<0.000000e+00> : vector<8x8xf32>
    %72 = tpu.matmul %71, %58, %cst_21 {dimension_numbers = #tpu.dot_dimension_numbers<[1], [0], [0], [1], [0, 0, 1, 1], [], []>} : vector<8x8xbf16>, vector<8x8xbf16>, vector<8x8xf32> -> vector<8x8xf32>
    %73 = tpu.concatenate %21, %38, %55, %72 in 1 : vector<8x8xf32>, vector<8x8xf32>, vector<8x8xf32>, vector<8x8xf32> -> vector<8x32xf32>
    %c0_22 = arith.constant 0 : index
    %c0_23 = arith.constant 0 : index
    %c0_24 = arith.constant 0 : index
    %74 = vector.load %arg4[%c0_22, %c0_23, %c0_24] : memref<1x8x32xf32, #tpu.memory_space<vmem>>, vector<1x8x32xf32>
    %75 = vector.shape_cast %74 : vector<1x8x32xf32> to vector<8x32xf32>
    %76 = vector.shape_cast %73 : vector<8x32xf32> to vector<1x8x32xf32>
    tpu.vector_store %arg4[%c0_22, %c0_23, %c0_24], %76 {strides = array<i32>} : memref<1x8x32xf32, #tpu.memory_space<vmem>>, vector<1x8x32xf32>,
    return
  }
  func.func @transform_0(%arg0: i32) -> (i32, i32, i32) {
    %c0_i32 = arith.constant 0 : i32
    %c0_i32_0 = arith.constant 0 : i32
    %c0_i32_1 = arith.constant 0 : i32
    return %arg0, %c0_i32, %c0_i32_0 : i32, i32, i32
  }
  func.func @transform_1(%arg0: i32) -> (i32, i32, i32) {
    %c0_i32 = arith.constant 0 : i32
    %c0_i32_0 = arith.constant 0 : i32
    %c0_i32_1 = arith.constant 0 : i32
    return %arg0, %c0_i32, %c0_i32_0 : i32, i32, i32
  }
  func.func @transform_2(%arg0: i32) -> (i32, i32) {
    %c0_i32 = arith.constant 0 : i32
    %c0_i32_0 = arith.constant 0 : i32
    %c0_i32_1 = arith.constant 0 : i32
    return %c0_i32, %c0_i32_0 : i32, i32
  }
  func.func @transform_3(%arg0: i32) -> (i32, i32, i32) {
    %c0_i32 = arith.constant 0 : i32
    %c0_i32_0 = arith.constant 0 : i32
    %c0_i32_1 = arith.constant 0 : i32
    return %arg0, %c0_i32, %c0_i32_0 : i32, i32, i32
  }
}

</mosaic_0001>

<bundles_post_ra>
// kernel: pt_transformer_forward.42
= control target key start
LH: loop header
LB: loop body
LE: loop exit
PB: predicated region body
PF: predicated region fallthrough
CT: control target
= control target key end

     0   :  { %s231_s1 = inlined_call_operand.vmem [shape: bf16[128,128], index: 1, kind: input, shape index: {}]   ;;  %s232_s2 = inlined_call_operand.vmem [shape: f32[1,128], index: 2, kind: input, shape index: {}]   ;;  %s233_s0 = inlined_call_operand.vmem [shape: bf16[16,128], index: 0, kind: input, shape index: {}]   ;;  %s234_s3 = inlined_call_operand.vmem [shape: f32[16,128], index: 3, kind: output, shape index: {}]  }
   0x1   :  { %v173_v0 = vld [vmem:[%s231_s1 + $0x38] sm:$0xff]  ;;  %v172_v1 = vld [vmem:[%s231_s1 + $0x30] sm:$0xff]  ;;  %v171_v2 = vld [vmem:[%s231_s1 + $0x28] sm:$0xff] }
   0x2   :  { %94 = vmatpush.bf16.msra.mxu0 %v173_v0  ;;  %v170_v3 = vld [vmem:[%s231_s1 + $0x20] sm:$0xff]  ;;  %v169_v4 = vld [vmem:[%s231_s1 + $0x18] sm:$0xff]  ;;  %v168_v5 = vld [vmem:[%s231_s1 + $0x10] sm:$0xff] }
   0x3   :  { %v167_v6 = vld [vmem:[%s231_s1 + $0x8] sm:$0xff]  ;;  %v166_v7 = vld [vmem:[%s231_s1] sm:$0xff] }
   0x4   :  { %v165_v8 = vld [vmem:[%s233_s0] sm:$0xff] }
   0x5   :  { %v174_v9 = vld [vmem:[%s232_s2] ss:$0 sm:$0xff] }
   0x6   :  { %95 = vmatpush.bf16.msra.mxu0 %v172_v1 }
   0xa   :  { %96 = vmatpush.bf16.msra.mxu0 %v171_v2 }
   0xe   :  { %97 = vmatpush.bf16.msra.mxu0 %v170_v3 }
  0x12   :  { %98 = vmatpush.bf16.msra.mxu0 %v169_v4 }
  0x16   :  { %99 = vmatpush.bf16.msra.mxu0 %v168_v5 }
  0x1a   :  { %100 = vmatpush.bf16.msra.mxu0 %v167_v6 }
  0x1e   :  { %101 = vmatpush.bf16.msra.mxu0 %v166_v7 }
  0x21   :  { %102 = vmatmul.bf16.vlgmr.msra.gmra.mxu0 %v165_v8 }
  0x9e   :  { %v103_v10 = vpop.f32.mrf.mxu0 }
  0x9f   :  { %v121_v11 = vadd.f32 %v174_v9, %v103_v10 }
  0xa1   :  { %123 = vst [vmem:[%s234_s3] sm:$0xff] %v121_v11 }
  0xa6   :  { %v105_v12 = vpop.f32.mrf.mxu0 }
  0xa7   :  { %v122_v13 = vadd.f32 %v174_v9, %v105_v12 }
  0xa9   :  { %124 = vst [vmem:[%s234_s3 + $0x8] sm:$0xff] %v122_v13 }

// kernel: pt_transformer_forward.43
= control target key start
LH: loop header
LB: loop body
LE: loop exit
PB: predicated region body
PF: predicated region fallthrough
CT: control target
= control target key end

     0   :  { %s589_s12 = smov 0   ;;  %s653_s0 = inlined_call_operand.vmem [shape: bf16[2,8,32], index: 0, kind: input, shape index: {}]   ;;  %s654_s1 = inlined_call_operand.vmem [shape: bf16[2,8,64], index: 1, kind: input, shape index: {}]   ;;  %s655_s2 = inlined_call_operand.vmem [shape: f32[8,8], index: 2, kind: input, shape index: {}]   ;;  %s656_s3 = inlined_call_operand.vmem [shape: f32[2,8,32], index: 3, kind: output, shape index: {}]  }
   0x1 LB: > { %s499_s13 = sadd.s32 4294967295, %s557_s12   ;;  %p503_p0 = scmp.ge.s32.totalorder %s557_s12, 1  ;;  %s557_s12 = sphi %s589_s12, %s13_s12  }
   0x2   : > { %p145_p1 = scmp.lt.s32.totalorder %s557_s12, 3 }
   0x4   : > { %p146_p2 = pnand %p503_p0, %p145_p1 }
   0x5   : > { %p171_p3 = scmp.lt.s32.totalorder (!%p146_p2), %s499_s13, 1  ;;  %s559_s21 = smov (!%p146_p2), 96  }
   0x6   : > { %149 = sbr.rel (%p146_p2) target bundleno = 1076 (0x434), region = 32  ;;  %s560_s22 = smov (!%p146_p2), 112  }
   0x7   : > { %s561_s23 = smov (!%p146_p2), 104   ;;  %s562_s26 = smov (!%p146_p2), 120  }
   0x8   : > { %s563_s27 = smov (!%p146_p2), 88   ;;  %s564_s28 = smov (!%p146_p2), 80  }
   0x9   : > { %s565_s29 = smov (!%p146_p2), 72   ;;  %s566_s30 = smov (!%p146_p2), 8  }
   0xa   : > { %s567_s4 = smov (!%p146_p2), 24   ;;  %s568_s5 = smov (!%p146_p2), 16  }
   0xb   : > { %s658_s13 = smov (!%p171_p3, %s499_s13), 1  ;;  %vm187_vm0 = vcmask 64512   ;;  %v186_v7 = vld [vmem:[%s655_s2] sm:$0xff]  ;;  %vm227_vm1 = vcmask 1043456   ;;  %vm428_vm2 = vcmask 130048   ;;  %vm430_vm3 = vcmask 195584  }
   0xc   : > { %s504_s14 = sshll.u32 %s658_s13, 2  ;;  %s506_s6 = sshll.u32 %s658_s13, 3  ;;  %vm432_vm4 = vcmask 261120  }
   0xd   : > { %s178_s17 = scalar_lea.vmem %s654_s1, %s504_s14  ;;  %s174_s20 = scalar_lea.vmem %s653_s0, %s504_s14 }
   0xe   : > { %v185_v0 = vld [vmem:[%s178_s17] sm:$0xf]  ;;  %s182_s9 = scalar_lea.vmem %s656_s3, %s506_s6 }
   0xf   : > { %v192_v1 = vsel %vm187_vm0, %v185_v0, 0  ;;  %v184_v2 = vld [vmem:[%s174_s20] sm:$0xf]  ;;  %v220_v3 = vunpack.c.l.b16 %v185_v0 }
  0x10   : > { %201 = vmatpush.bf16.xpose.msra.mxu0 %v192_v1  ;;  %v245_v5 = vunpack.c.l.b16 %v184_v2 }
  0x11   : > { %v608_v4 = vpack.c.b16 %v220_v3, %v220_v3 }
  0x12   : > { %v246_v6 = vpack.c.b16 %v245_v5, %v245_v5 }
  0x13   : > { %222 = vrot.lane.b32.xlu2 %v608_v4, %s559_s21 }
  0x17   : > { %507 = vmatmul.msk.bf16.vlgmr.msra.gmra.mxu0 %vm187_vm0, %v184_v2 }
  0x1b   : > { %305 = vrot.lane.b32.xlu2 %v608_v4, %s560_s22 }
  0x23   : > { %361 = vrot.lane.b32.xlu2 %v608_v4, %s561_s23 }
  0x2b   : > { %303 = vrot.lane.b32.xlu2 %v246_v6, %s560_s22 }
  0x6d   : > { %v223_v12 = vpop.permute.xlu2 %222 }
  0x6e   : > { %v229_v23 = vsel %vm227_vm1, %v223_v12, 0 }
  0x6f   : > { %238 = vmatpush.bf16.msra.mxu1 %v229_v23 }
  0x75   : > { %v306_v13 = vpop.permute.xlu2 %305 }
  0x76   : > { %v311_v24 = vsel %vm187_vm0, %v306_v13, 0 }
  0x77   : > { %320 = vmatpush.bf16.xpose.msrb.mxu1 %v311_v24 }
  0x7d   : > { %v362_v17 = vpop.permute.xlu2 %361 }
  0x7e   : > { %v367_v18 = vsel %vm187_vm0, %v362_v17, 0 }
  0x7f   : > { %376 = vmatpush.bf16.xpose.msrb.mxu0 %v367_v18 }
  0x85   : > { %v304_v31 = vpop.permute.xlu2 %303 }
  0x94   : > { %v203_v8 = vpop.f32.mrf.mxu0 }
  0x95   : > { %v204_v9 = vadd.f32 %v203_v8, %v186_v7 }
  0x97   : > { %v207_v10 = vsel %vm187_vm0, %v204_v9, -inf }
  0x98   : > { %208 = vmax.xlane.f32.xlu0 %v207_v10 }
  0x9c   : > { %v205_v11 = vpop.f32.mrf.mxu0 }
  0xac   : > { %249 = vrot.lane.b32.xlu0 %v608_v4, %s562_s26 }
  0xb4   : > { %359 = vrot.lane.b32.xlu0 %v246_v6, %s561_s23 }
 0x10b   : > { %v209_v14 = vpop.xlane.xlu0 %208 }
 0x10c   : > { %v210_v15 = vsub.f32 %v204_v9, %v209_v14 }
 0x10e   : > { %v211_v16 = vmul.f32 1.442695, %v210_v15 }
 0x110   : > { %535 = vpow2.f32 %v211_v16 }
 0x116   : > { %v536_v19 = vpop.eup %535 }
 0x117   : > { %v213_v20 = vsel %vm187_vm0, %v536_v19, 0.0 }
 0x118   : > { %214 = vadd.xlane.f32.xlu1 %v213_v20 }
 0x11e   : > { %v250_v21 = vpop.permute.xlu0 %249 }
 0x11f   : > { %v255_v25 = vsel %vm187_vm0, %v250_v21, 0 }
 0x120   : > { %264 = vmatpush.bf16.xpose.msra.mxu2 %v255_v25 }
 0x126   : > { %v360_v22 = vpop.permute.xlu0 %359 }
 0x127   : > { %513 = vmatmul.msk.bf16.vlgmr.msrb.gmra.mxu0 %vm187_vm0, %v360_v22 }
 0x131   : > { %247 = vrot.lane.b32.xlu1 %v246_v6, %s562_s26 }
 0x18b   : > { %v215_v26 = vpop.xlane.xlu1 %214 }
 0x18c   : > { %537 = vrcp.f32 %v215_v26 }
 0x192   : > { %v538_v27 = vpop.eup %537 }
 0x193   : > { %v217_v28 = vmul.f32 %v538_v27, %v536_v19 }
 0x195   : > { %v218_v29 = vpack.c.bf16 %v217_v28, %v217_v28 }
 0x197   : > { %508 = vmatmul.msk.bf16.vlgmr.msra.gmra.mxu1 %vm187_vm0, %v218_v29 }
 0x1a3   : > { %v248_v30 = vpop.permute.xlu1 %247 }
 0x1a4   : > { %509 = vmatmul.msk.bf16.vlgmr.msra.gmra.mxu2 %vm187_vm0, %v248_v30  ;;  %v378_v32 = vpop.f32.mrf.mxu0 }
 0x1a5   : > { %v379_v33 = vadd.f32 %v378_v32, %v186_v7 }
 0x1a7   : > { %511 = vmatmul.msk.bf16.vlgmr.msrb.gmra.mxu1 %vm187_vm0, %v304_v31  ;;  %v382_v34 = vsel %vm187_vm0, %v379_v33, -inf }
 0x1a8   : > { %383 = vmax.xlane.f32.xlu0 %v382_v34 }
 0x1ac   : > { %v380_v35 = vpop.f32.mrf.mxu0 }
 0x214   : > { %v628_v36 = vpop.f32.mrf.mxu1 }
 0x21b   : > { %v384_v48 = vpop.xlane.xlu0 %383 }
 0x21c   : > { %v242_v37 = vpop.f32.mrf.mxu1  ;;  %v385_v52 = vsub.f32 %v379_v33, %v384_v48 }
 0x21e   : > { %v386_v54 = vmul.f32 1.442695, %v385_v52 }
 0x224   : > { %v322_v38 = vpop.f32.mrf.mxu1 }
 0x225   : > { %v323_v39 = vadd.f32 %v322_v38, %v186_v7 }
 0x227   : > { %v266_v40 = vpop.f32.mrf.mxu2  ;;  %v326_v41 = vsel %vm187_vm0, %v323_v39, -inf }
 0x228   : > { %v267_v42 = vadd.f32 %v266_v40, %v186_v7  ;;  %327 = vmax.xlane.f32.xlu1 %v326_v41 }
 0x22a   : > { %v270_v43 = vsel %vm187_vm0, %v267_v42, -inf }
 0x22b   : > { %271 = vmax.xlane.f32.xlu2 %v270_v43 }
 0x22c   : > { %v324_v44 = vpop.f32.mrf.mxu1 }
 0x22f   : > { %v268_v45 = vpop.f32.mrf.mxu2 }
 0x241   : > { %282 = vrot.lane.b32.xlu1 %v608_v4, %s563_s27 }
 0x29b   : > { %v328_v46 = vpop.xlane.xlu1 %327 }
 0x29c   : > { %v329_v47 = vsub.f32 %v323_v39, %v328_v46 }
 0x29e   : > { %v330_v49 = vmul.f32 1.442695, %v329_v47  ;;  %v272_v50 = vpop.xlane.xlu2 %271 }
 0x29f   : > { %v273_v51 = vsub.f32 %v267_v42, %v272_v50 }
 0x2a0   : > { %539 = vpow2.f32 %v330_v49 }
 0x2a1   : > { %v274_v53 = vmul.f32 1.442695, %v273_v51 }
 0x2a3   : > { %541 = vpow2.f32 %v274_v53 }
 0x2a4   : > { %543 = vpow2.f32 %v386_v54 }
 0x2a6   : > { %v540_v55 = vpop.eup %539 }
 0x2a7   : > { %v332_v56 = vsel %vm187_vm0, %v540_v55, 0.0 }
 0x2a8   : > { %333 = vadd.xlane.f32.xlu0 %v332_v56 }
 0x2a9   : > { %v542_v57 = vpop.eup %541 }
 0x2aa   : > { %v276_v58 = vsel %vm187_vm0, %v542_v57, 0.0  ;;  %v544_v59 = vpop.eup %543 }
 0x2ab   : > { %277 = vadd.xlane.f32.xlu2 %v276_v58  ;;  %v388_v60 = vsel %vm187_vm0, %v544_v59, 0.0 }
 0x2b3   : > { %389 = vadd.xlane.f32.xlu2 %v388_v60  ;;  %v283_v61 = vpop.permute.xlu1 %282 }
 0x2b4   : > { %v288_v62 = vsel %vm227_vm1, %v283_v61, 0 }
 0x2b5   : > { %297 = vmatpush.bf16.msra.mxu3 %v288_v62 }
 0x2bc   : > { %338 = vrot.lane.b32.xlu0 %v608_v4, %s564_s28 }
 0x2cb   : > { %394 = vrot.lane.b32.xlu2 %v608_v4, %s565_s29 }
 0x31b   : > { %v334_v1 = vpop.xlane.xlu0 %333 }
 0x31e   : > { %v278_v63 = vpop.xlane.xlu2 %277 }
 0x31f   : > { %545 = vrcp.f32 %v278_v63 }
 0x325   : > { %v546_v0 = vpop.eup %545 }
 0x326   : > { %v390_v2 = vpop.xlane.xlu2 %389  ;;  %v280_v3 = vmul.f32 %v546_v0, %v542_v57 }
 0x327   : > { %547 = vrcp.f32 %v390_v2 }
 0x328   : > { %v281_v5 = vpack.c.bf16 %v280_v3, %v280_v3  ;;  %549 = vrcp.f32 %v334_v1 }
 0x32a   : > { %510 = vmatmul.msk.bf16.vlgmr.msra.gmra.mxu3 %vm187_vm0, %v281_v5 }
 0x32d   : > { %v548_v6 = vpop.eup %547 }
 0x32e   : > { %v392_v7 = vmul.f32 %v548_v6, %v544_v59  ;;  %v395_v8 = vpop.permute.xlu2 %394  ;;  %v339_v9 = vpop.permute.xlu0 %338 }
 0x32f   : > { %v344_v4 = vsel %vm227_vm1, %v339_v9, 0  ;;  %v400_v10 = vsel %vm227_vm1, %v395_v8, 0  ;;  %v550_v12 = vpop.eup %549 }
 0x330   : > { %353 = vmatpush.bf16.msrb.mxu3 %v344_v4  ;;  %409 = vmatpush.bf16.msrb.mxu2 %v400_v10  ;;  %v393_v11 = vpack.c.bf16 %v392_v7, %v392_v7  ;;  %v336_v13 = vmul.f32 %v550_v12, %v540_v55 }
 0x332   : > { %v337_v14 = vpack.c.bf16 %v336_v13, %v336_v13 }
 0x333   : > { %514 = vmatmul.msk.bf16.vlgmr.msrb.gmra.mxu2 %vm187_vm0, %v393_v11 }
 0x33a   : > { %512 = vmatmul.msk.bf16.vlgmr.msrb.gmra.mxu3 %vm187_vm0, %v337_v14 }
 0x3ad   : > { %v299_v15 = vpop.f32.mrf.mxu3 }
 0x3ae   : > { %416 = vrot.lane.b32.xlu1 %v299_v15, %s566_s30 }
 0x3b5   : > { %v301_v16 = vpop.f32.mrf.mxu3 }
 0x3b6   : > { %v411_v17 = vpop.f32.mrf.mxu2 }
 0x3b7   : > { %424 = vrot.lane.b32.xlu1 %v411_v17, %s567_s4 }
 0x3bd   : > { %v355_v18 = vpop.f32.mrf.mxu3 }
 0x3be   : > { %v413_v19 = vpop.f32.mrf.mxu2  ;;  %420 = vrot.lane.b32.xlu0 %v355_v18, %s568_s5 }
 0x3c5   : > { %v357_v20 = vpop.f32.mrf.mxu3 }
 0x420   : > { %v417_v21 = vpop.permute.xlu1 %416 }
 0x421   : > { %v427_v22 = vsel %vm187_vm0, %v628_v36, %v417_v21 }
 0x429   : > { %v425_v24 = vpop.permute.xlu1 %424 }
 0x430   : > { %v421_v23 = vpop.permute.xlu0 %420 }
 0x431   : > { %v429_v25 = vsel %vm428_vm2, %v427_v22, %v421_v23 }
 0x432   : > { %v431_v26 = vsel %vm430_vm3, %v429_v25, %v425_v24 }
 0x433   : > { %433 = vst.msk [vmem:[%s182_s9] sm:$0xff] %vm432_vm4, %v431_v26 }
 0x434 PF: > { %s13_s12 = sadd.s32 1, %s557_s12  }
 0x435   : > { %p10_p4 = scmp.ge.s32.totalorder %s13_s12, 4  }
 0x437   :  { %12 = sbr.rel (!%p10_p4) target bundleno = 1 (0x1), region = 65 }

// kernel: pt_transformer_forward.44
= control target key start
LH: loop header
LB: loop body
LE: loop exit
PB: predicated region body
PF: predicated region fallthrough
CT: control target
= control target key end

     0   :  { %vm27_vm0 = vcmask 261120   ;;  %v263_v2 = vmov 0.0   ;;  %v264_v27 = vmov 32.0   ;;  %s358_s1 = inlined_call_operand.vmem [shape: bf16[128,32], index: 1, kind: input, shape index: {}]   ;;  %s359_s0 = inlined_call_operand.vmem [shape: bf16[16,128], index: 0, kind: input, shape index: {}]   ;;  %s360_s2 = inlined_call_operand.vmem [shape: f32[1,32], index: 2, kind: input, shape index: {}]   ;;  %s361_s3 = inlined_call_operand.vmem [shape: f32[16,32], index: 3, kind: input, shape index: {}]   ;;  %s362_s4 = inlined_call_operand.vmem [shape: f32[1,32], index: 4, kind: input, shape index: {}]   ;;  %s363_s5 = inlined_call_operand.vmem [shape: f32[1,32], index: 5, kind: input, shape index: {}]   ;;  %s364_s6 = inlined_call_operand.vmem [shape: f32[16,32], index: 6, kind: output, shape index: {}]  }
   0x1   :  { %v251_v0 = vld [vmem:[%s358_s1 + $0x38] sm:$0xff]  ;;  %v250_v1 = vld [vmem:[%s358_s1 + $0x30] sm:$0xff]  ;;  %28 = vst.msk [vmem:[#allocation2] sm:$0xff] %vm27_vm0, %v263_v2  ;;  %v249_v3 = vld [vmem:[%s358_s1 + $0x28] sm:$0xff]  ;;  %257 = vrcp.f32 %v264_v27 }
   0x2   :  { %104 = vmatpush.bf16.msra.mxu0 %v251_v0  ;;  %29 = vst.msk [vmem:[#allocation2 + $0x8] sm:$0xff] %vm27_vm0, %v263_v2  ;;  %v248_v4 = vld [vmem:[%s358_s1 + $0x20] sm:$0xff]  ;;  %v247_v5 = vld [vmem:[%s358_s1 + $0x18] sm:$0xff]  ;;  %v246_v6 = vld [vmem:[%s358_s1 + $0x10] sm:$0xff] }
   0x3   :  { %v245_v7 = vld [vmem:[%s358_s1 + $0x8] sm:$0xff]  ;;  %v244_v8 = vld [vmem:[%s358_s1] sm:$0xff] }
   0x4   :  { %v243_v9 = vld [vmem:[%s359_s0] sm:$0xff]  ;;  %v135_v23 = vld [vmem:[%s361_s3 + $0x8] sm:$0xff] }
   0x5   :  { %v254_v14 = vld [vmem:[%s360_s2] ss:$0 sm:$0xff] }
   0x6   :  { %105 = vmatpush.bf16.msra.mxu0 %v250_v1  ;;  %v134_v18 = vld [vmem:[%s361_s3] sm:$0xff] }
   0x7   :  { %v258_v28 = vpop.eup %257  ;;  %v255_v58 = vld [vmem:[%s362_s4] ss:$0 sm:$0xff] }
   0x8   :  { %v30_v10 = vld [vmem:[#allocation2] sm:$0xff]  ;;  %v145_v29 = vmul.f32 32.0, %v258_v28  ;;  %vm149_vm1 = vweird.f32 %v258_v28 }
   0x9   :  { %v31_v13 = vld [vmem:[#allocation2 + $0x8] sm:$0xff]  ;;  %v256_v61 = vld [vmem:[%s363_s5] ss:$0 sm:$0xff] }
   0xa   :  { %106 = vmatpush.bf16.msra.mxu0 %v249_v3  ;;  %v146_v30 = vsub.f32 1.0, %v145_v29 }
   0xc   :  { %v147_v31 = vmul.f32 %v258_v28, %v146_v30 }
   0xe   :  { %107 = vmatpush.bf16.msra.mxu0 %v248_v4  ;;  %v148_v32 = vadd.f32 %v258_v28, %v147_v31 }
  0x10   :  { %v150_v33 = vsel %vm149_vm1, %v258_v28, %v148_v32 }
  0x12   :  { %108 = vmatpush.bf16.msra.mxu0 %v247_v5 }
  0x16   :  { %109 = vmatpush.bf16.msra.mxu0 %v246_v6 }
  0x1a   :  { %110 = vmatpush.bf16.msra.mxu0 %v245_v7 }
  0x1e   :  { %111 = vmatpush.bf16.msra.mxu0 %v244_v8 }
  0x21   :  { %112 = vmatmul.bf16.vlgmr.msra.gmra.mxu0 %v243_v9 }
  0x9e   :  { %v113_v11 = vpop.f32.mrf.mxu0 }
  0x9f   :  { %v118_v12 = vadd.f32 %v113_v11, %v30_v10 }
  0xa1   :  { %121 = vst.msk [vmem:[#allocation2] sm:$0xff] %vm27_vm0, %v118_v12 }
  0xa6   :  { %v115_v15 = vpop.f32.mrf.mxu0 }
  0xa7   :  { %v119_v16 = vadd.f32 %v115_v15, %v31_v13 }
  0xa8   :  { %v126_v17 = vld [vmem:[#allocation2] sm:$0xff] }
  0xa9   :  { %122 = vst.msk [vmem:[#allocation2 + $0x8] sm:$0xff] %vm27_vm0, %v119_v16  ;;  %v132_v19 = vadd.f32 %v254_v14, %v126_v17 }
  0xab   :  { %v136_v20 = vadd.f32 %v134_v18, %v132_v19 }
  0xad   :  { %v138_v21 = vsel %vm27_vm0, %v136_v20, 0.0 }
  0xae   :  { %139 = vadd.xlane.f32.xlu0 %v138_v21 }
  0xb0   :  { %v127_v22 = vld [vmem:[#allocation2 + $0x8] sm:$0xff] }
  0xb1   :  { %v133_v24 = vadd.f32 %v254_v14, %v127_v22 }
  0xb3   :  { %v137_v25 = vadd.f32 %v135_v23, %v133_v24 }
  0xb5   :  { %v141_v26 = vsel %vm27_vm0, %v137_v25, 0.0 }
  0xb6   :  { %142 = vadd.xlane.f32.xlu0 %v141_v26 }
 0x121   :  { %v140_v34 = vpop.xlane.xlu0 %139 }
 0x122   :  { %v151_v35 = vmul.f32 %v150_v33, %v140_v34 }
 0x124   :  { %v153_v36 = vsub.f32 %v136_v20, %v151_v35 }
 0x126   :  { %v155_v37 = vmul.f32 %v153_v36, %v153_v36 }
 0x128   :  { %v157_v38 = vsel %vm27_vm0, %v155_v37, 0.0 }
 0x129   :  { %158 = vadd.xlane.f32.xlu1 %v157_v38  ;;  %v143_v39 = vpop.xlane.xlu0 %142 }
 0x12a   :  { %v152_v40 = vmul.f32 %v150_v33, %v143_v39 }
 0x12c   :  { %v154_v41 = vsub.f32 %v137_v25, %v152_v40 }
 0x12e   :  { %v156_v42 = vmul.f32 %v154_v41, %v154_v41 }
 0x130   :  { %v160_v43 = vsel %vm27_vm0, %v156_v42, 0.0 }
 0x131   :  { %161 = vadd.xlane.f32.xlu1 %v160_v43 }
 0x19c   :  { %v159_v44 = vpop.xlane.xlu1 %158 }
 0x19d   :  { %v163_v45 = vmul.f32 %v159_v44, %v150_v33 }
 0x19f   :  { %v165_v46 = vadd.f32 1e-05, %v163_v45 }
 0x1a1   :  { %259 = vrsqrt.f32 %v165_v46  ;;  %vm173_vm3 = vweird.f32 %v165_v46 }
 0x1a4   :  { %v162_v47 = vpop.xlane.xlu1 %161 }
 0x1a5   :  { %v164_v48 = vmul.f32 %v162_v47, %v150_v33 }
 0x1a7   :  { %v260_v49 = vpop.eup %259  ;;  %v166_v50 = vadd.f32 1e-05, %v164_v48 }
 0x1a8   :  { %v168_v51 = vmul.f32 %v260_v49, %v165_v46  ;;  %vm174_vm2 = vweird.f32 %v260_v49 }
 0x1a9   :  { %261 = vrsqrt.f32 %v166_v50  ;;  %vm175_vm4 = vmor %vm173_vm3, %vm174_vm2  ;;  %vm183_vm6 = vweird.f32 %v166_v50 }
 0x1aa   :  { %v169_v52 = vmul.f32 %v260_v49, %v168_v51 }
 0x1ac   :  { %v170_v53 = vmul.f32 0.5, %v169_v52 }
 0x1ae   :  { %v171_v54 = vsub.f32 1.5, %v170_v53 }
 0x1af   :  { %v262_v55 = vpop.eup %261 }
 0x1b0   :  { %v172_v56 = vmul.f32 %v260_v49, %v171_v54  ;;  %v178_v57 = vmul.f32 %v262_v55, %v166_v50  ;;  %vm184_vm5 = vweird.f32 %v262_v55 }
 0x1b1   :  { %vm185_vm7 = vmor %vm183_vm6, %vm184_vm5 }
 0x1b2   :  { %v176_v59 = vsel %vm175_vm4, %v260_v49, %v172_v56  ;;  %v179_v60 = vmul.f32 %v262_v55, %v178_v57 }
 0x1b3   :  { %v187_v62 = vmul.f32 %v176_v59, %v153_v36 }
 0x1b4   :  { %v180_v63 = vmul.f32 0.5, %v179_v60 }
 0x1b5   :  { %v193_v0 = vmul.f32 %v255_v58, %v187_v62 }
 0x1b6   :  { %v181_v1 = vsub.f32 1.5, %v180_v63 }
 0x1b7   :  { %v199_v2 = vadd.f32 %v256_v61, %v193_v0 }
 0x1b8   :  { %v182_v3 = vmul.f32 %v262_v55, %v181_v1 }
 0x1b9   :  { %201 = vst.msk [vmem:[%s364_s6] sm:$0xff] %vm27_vm0, %v199_v2 }
 0x1ba   :  { %v186_v4 = vsel %vm185_vm7, %v262_v55, %v182_v3 }
 0x1bb   :  { %v188_v5 = vmul.f32 %v186_v4, %v154_v41 }
 0x1bd   :  { %v194_v6 = vmul.f32 %v255_v58, %v188_v5 }
 0x1bf   :  { %v200_v7 = vadd.f32 %v256_v61, %v194_v6 }
 0x1c1   :  { %202 = vst.msk [vmem:[%s364_s6 + $0x8] sm:$0xff] %vm27_vm0, %v200_v7 }

// kernel: pt_transformer_forward.34
= control target key start
LH: loop header
LB: loop body
LE: loop exit
PB: predicated region body
PF: predicated region fallthrough
CT: control target
= control target key end

     0   :  { %s233_s1 = inlined_call_operand.vmem [shape: bf16[128,128], index: 1, kind: input, shape index: {}]   ;;  %s234_s2 = inlined_call_operand.vmem [shape: f32[1,128], index: 2, kind: input, shape index: {}]   ;;  %s235_s0 = inlined_call_operand.vmem [shape: bf16[16,128], index: 0, kind: input, shape index: {}]   ;;  %s236_s3 = inlined_call_operand.vmem [shape: f32[16,128], index: 3, kind: output, shape index: {}]  }
   0x1   :  { %v175_v0 = vld [vmem:[%s233_s1 + $0x38] sm:$0xff]  ;;  %v174_v1 = vld [vmem:[%s233_s1 + $0x30] sm:$0xff]  ;;  %v173_v2 = vld [vmem:[%s233_s1 + $0x28] sm:$0xff] }
   0x2   :  { %94 = vmatpush.bf16.msra.mxu0 %v175_v0  ;;  %v172_v3 = vld [vmem:[%s233_s1 + $0x20] sm:$0xff]  ;;  %v171_v4 = vld [vmem:[%s233_s1 + $0x18] sm:$0xff]  ;;  %v170_v5 = vld [vmem:[%s233_s1 + $0x10] sm:$0xff] }
   0x3   :  { %v169_v6 = vld [vmem:[%s233_s1 + $0x8] sm:$0xff]  ;;  %v168_v7 = vld [vmem:[%s233_s1] sm:$0xff] }
   0x4   :  { %v167_v8 = vld [vmem:[%s235_s0] sm:$0xff] }
   0x5   :  { %v176_v9 = vld [vmem:[%s234_s2] ss:$0 sm:$0xff] }
   0x6   :  { %95 = vmatpush.bf16.msra.mxu0 %v174_v1 }
   0xa   :  { %96 = vmatpush.bf16.msra.mxu0 %v173_v2 }
   0xe   :  { %97 = vmatpush.bf16.msra.mxu0 %v172_v3 }
  0x12   :  { %98 = vmatpush.bf16.msra.mxu0 %v171_v4 }
  0x16   :  { %99 = vmatpush.bf16.msra.mxu0 %v170_v5 }
  0x1a   :  { %100 = vmatpush.bf16.msra.mxu0 %v169_v6 }
  0x1e   :  { %101 = vmatpush.bf16.msra.mxu0 %v168_v7 }
  0x21   :  { %102 = vmatmul.bf16.vlgmr.msra.gmra.mxu0 %v167_v8 }
  0x9e   :  { %v103_v10 = vpop.f32.mrf.mxu0 }
  0x9f   :  { %v121_v11 = vadd.f32 %v176_v9, %v103_v10 }
  0xa1   :  { %v123_v12 = vmax.f32 %v121_v11, 0.0 }
  0xa3   :  { %125 = vst [vmem:[%s236_s3] sm:$0xff] %v123_v12 }
  0xa6   :  { %v105_v13 = vpop.f32.mrf.mxu0 }
  0xa7   :  { %v122_v14 = vadd.f32 %v176_v9, %v105_v13 }
  0xa9   :  { %v124_v15 = vmax.f32 %v122_v14, 0.0 }
  0xab   :  { %126 = vst [vmem:[%s236_s3 + $0x8] sm:$0xff] %v124_v15 }

// kernel: pt_transformer_forward.41
= control target key start
LH: loop header
LB: loop body
LE: loop exit
PB: predicated region body
PF: predicated region fallthrough
CT: control target
= control target key end

     0   :  { %vm16_vm0 = vcmask 261120   ;;  %v95_v4 = vmov 32.0   ;;  %s140_s0 = inlined_call_operand.vmem [shape: f32[16,32], index: 0, kind: input, shape index: {}]   ;;  %s141_s1 = inlined_call_operand.vmem [shape: f32[1,32], index: 1, kind: input, shape index: {}]   ;;  %s142_s2 = inlined_call_operand.vmem [shape: f32[1,32], index: 2, kind: input, shape index: {}]   ;;  %s143_s3 = inlined_call_operand.vmem [shape: f32[16,32], index: 3, kind: output, shape index: {}]  }
   0x1   :  { %v14_v0 = vld [vmem:[%s140_s0] sm:$0xff]  ;;  %v15_v2 = vld [vmem:[%s140_s0 + $0x8] sm:$0xff]  ;;  %89 = vrcp.f32 %v95_v4 }
   0x2   :  { %v17_v1 = vsel %vm16_vm0, %v14_v0, 0.0  ;;  %v20_v3 = vsel %vm16_vm0, %v15_v2, 0.0  ;;  %v87_v35 = vld [vmem:[%s141_s1] ss:$0 sm:$0xff] }
   0x3   :  { %18 = vadd.xlane.f32.xlu0 %v17_v1  ;;  %v88_v38 = vld [vmem:[%s142_s2] ss:$0 sm:$0xff] }
   0x7   :  { %v90_v5 = vpop.eup %89 }
   0x8   :  { %v24_v6 = vmul.f32 32.0, %v90_v5  ;;  %vm28_vm1 = vweird.f32 %v90_v5 }
   0xa   :  { %v25_v7 = vsub.f32 1.0, %v24_v6 }
   0xb   :  { %21 = vadd.xlane.f32.xlu0 %v20_v3 }
   0xc   :  { %v26_v8 = vmul.f32 %v90_v5, %v25_v7 }
   0xe   :  { %v27_v9 = vadd.f32 %v90_v5, %v26_v8 }
  0x10   :  { %v29_v10 = vsel %vm28_vm1, %v90_v5, %v27_v9 }
  0x76   :  { %v19_v11 = vpop.xlane.xlu0 %18 }
  0x77   :  { %v30_v12 = vmul.f32 %v29_v10, %v19_v11 }
  0x79   :  { %v32_v13 = vsub.f32 %v14_v0, %v30_v12 }
  0x7b   :  { %v34_v14 = vmul.f32 %v32_v13, %v32_v13 }
  0x7d   :  { %v36_v15 = vsel %vm16_vm0, %v34_v14, 0.0 }
  0x7e   :  { %37 = vadd.xlane.f32.xlu1 %v36_v15  ;;  %v22_v16 = vpop.xlane.xlu0 %21 }
  0x7f   :  { %v31_v17 = vmul.f32 %v29_v10, %v22_v16 }
  0x81   :  { %v33_v18 = vsub.f32 %v15_v2, %v31_v17 }
  0x83   :  { %v35_v19 = vmul.f32 %v33_v18, %v33_v18 }
  0x85   :  { %v39_v20 = vsel %vm16_vm0, %v35_v19, 0.0 }
  0x86   :  { %40 = vadd.xlane.f32.xlu1 %v39_v20 }
  0xf1   :  { %v38_v21 = vpop.xlane.xlu1 %37 }
  0xf2   :  { %v42_v22 = vmul.f32 %v38_v21, %v29_v10 }
  0xf4   :  { %v44_v23 = vadd.f32 1e-05, %v42_v22 }
  0xf6   :  { %91 = vrsqrt.f32 %v44_v23  ;;  %vm52_vm3 = vweird.f32 %v44_v23 }
  0xf9   :  { %v41_v24 = vpop.xlane.xlu1 %40 }
  0xfa   :  { %v43_v25 = vmul.f32 %v41_v24, %v29_v10 }
  0xfc   :  { %v92_v26 = vpop.eup %91  ;;  %v45_v27 = vadd.f32 1e-05, %v43_v25 }
  0xfd   :  { %v47_v28 = vmul.f32 %v92_v26, %v44_v23  ;;  %vm53_vm2 = vweird.f32 %v92_v26 }
  0xfe   :  { %93 = vrsqrt.f32 %v45_v27  ;;  %vm54_vm4 = vmor %vm52_vm3, %vm53_vm2  ;;  %vm62_vm6 = vweird.f32 %v45_v27 }
  0xff   :  { %v48_v29 = vmul.f32 %v92_v26, %v47_v28 }
 0x101   :  { %v49_v30 = vmul.f32 0.5, %v48_v29 }
 0x103   :  { %v50_v31 = vsub.f32 1.5, %v49_v30 }
 0x104   :  { %v94_v32 = vpop.eup %93 }
 0x105   :  { %v51_v33 = vmul.f32 %v92_v26, %v50_v31  ;;  %v57_v34 = vmul.f32 %v94_v32, %v45_v27  ;;  %vm63_vm5 = vweird.f32 %v94_v32 }
 0x106   :  { %vm64_vm7 = vmor %vm62_vm6, %vm63_vm5 }
 0x107   :  { %v55_v36 = vsel %vm54_vm4, %v92_v26, %v51_v33  ;;  %v58_v37 = vmul.f32 %v94_v32, %v57_v34 }
 0x108   :  { %v66_v39 = vmul.f32 %v55_v36, %v32_v13 }
 0x109   :  { %v59_v40 = vmul.f32 0.5, %v58_v37 }
 0x10a   :  { %v72_v41 = vmul.f32 %v87_v35, %v66_v39 }
 0x10b   :  { %v60_v42 = vsub.f32 1.5, %v59_v40 }
 0x10c   :  { %v78_v43 = vadd.f32 %v88_v38, %v72_v41 }
 0x10d   :  { %v61_v44 = vmul.f32 %v94_v32, %v60_v42 }
 0x10e   :  { %80 = vst.msk [vmem:[%s143_s3] sm:$0xff] %vm16_vm0, %v78_v43 }
 0x10f   :  { %v65_v45 = vsel %vm64_vm7, %v94_v32, %v61_v44 }
 0x110   :  { %v67_v46 = vmul.f32 %v65_v45, %v33_v18 }
 0x112   :  { %v73_v47 = vmul.f32 %v87_v35, %v67_v46 }
 0x114   :  { %v79_v48 = vadd.f32 %v88_v38, %v73_v47 }
 0x116   :  { %81 = vst.msk [vmem:[%s143_s3 + $0x8] sm:$0xff] %vm16_vm0, %v79_v48 }

// kernel: pt_transformer_forward.47
= control target key start
LH: loop header
LB: loop body
LE: loop exit
PB: predicated region body
PF: predicated region fallthrough
CT: control target
= control target key end

     0   :  { %s589_s12 = smov 0   ;;  %s653_s0 = inlined_call_operand.vmem [shape: bf16[2,8,32], index: 0, kind: input, shape index: {}]   ;;  %s654_s1 = inlined_call_operand.vmem [shape: bf16[2,8,64], index: 1, kind: input, shape index: {}]   ;;  %s655_s2 = inlined_call_operand.vmem [shape: f32[8,8], index: 2, kind: input, shape index: {}]   ;;  %s656_s3 = inlined_call_operand.vmem [shape: f32[2,8,32], index: 3, kind: output, shape index: {}]  }
   0x1 LB: > { %s499_s13 = sadd.s32 4294967295, %s557_s12   ;;  %p503_p0 = scmp.ge.s32.totalorder %s557_s12, 1  ;;  %s557_s12 = sphi %s589_s12, %s13_s12  }
   0x2   : > { %p145_p1 = scmp.lt.s32.totalorder %s557_s12, 3 }
   0x4   : > { %p146_p2 = pnand %p503_p0, %p145_p1 }
   0x5   : > { %p171_p3 = scmp.lt.s32.totalorder (!%p146_p2), %s499_s13, 1  ;;  %s559_s21 = smov (!%p146_p2), 96  }
   0x6   : > { %149 = sbr.rel (%p146_p2) target bundleno = 1076 (0x434), region = 32  ;;  %s560_s22 = smov (!%p146_p2), 112  }
   0x7   : > { %s561_s23 = smov (!%p146_p2), 104   ;;  %s562_s26 = smov (!%p146_p2), 120  }
   0x8   : > { %s563_s27 = smov (!%p146_p2), 88   ;;  %s564_s28 = smov (!%p146_p2), 80  }
   0x9   : > { %s565_s29 = smov (!%p146_p2), 72   ;;  %s566_s30 = smov (!%p146_p2), 8  }
   0xa   : > { %s567_s4 = smov (!%p146_p2), 24   ;;  %s568_s5 = smov (!%p146_p2), 16  }
   0xb   : > { %s658_s13 = smov (!%p171_p3, %s499_s13), 1  ;;  %vm187_vm0 = vcmask 64512   ;;  %v186_v7 = vld [vmem:[%s655_s2] sm:$0xff]  ;;  %vm227_vm1 = vcmask 1043456   ;;  %vm428_vm2 = vcmask 130048   ;;  %vm430_vm3 = vcmask 195584  }
   0xc   : > { %s504_s14 = sshll.u32 %s658_s13, 2  ;;  %s506_s6 = sshll.u32 %s658_s13, 3  ;;  %vm432_vm4 = vcmask 261120  }
   0xd   : > { %s178_s17 = scalar_lea.vmem %s654_s1, %s504_s14  ;;  %s174_s20 = scalar_lea.vmem %s653_s0, %s504_s14 }
   0xe   : > { %v185_v0 = vld [vmem:[%s178_s17] sm:$0xf]  ;;  %s182_s9 = scalar_lea.vmem %s656_s3, %s506_s6 }
   0xf   : > { %v192_v1 = vsel %vm187_vm0, %v185_v0, 0  ;;  %v184_v2 = vld [vmem:[%s174_s20] sm:$0xf]  ;;  %v220_v3 = vunpack.c.l.b16 %v185_v0 }
  0x10   : > { %201 = vmatpush.bf16.xpose.msra.mxu0 %v192_v1  ;;  %v245_v5 = vunpack.c.l.b16 %v184_v2 }
  0x11   : > { %v608_v4 = vpack.c.b16 %v220_v3, %v220_v3 }
  0x12   : > { %v246_v6 = vpack.c.b16 %v245_v5, %v245_v5 }
  0x13   : > { %222 = vrot.lane.b32.xlu2 %v608_v4, %s559_s21 }
  0x17   : > { %507 = vmatmul.msk.bf16.vlgmr.msra.gmra.mxu0 %vm187_vm0, %v184_v2 }
  0x1b   : > { %305 = vrot.lane.b32.xlu2 %v608_v4, %s560_s22 }
  0x23   : > { %361 = vrot.lane.b32.xlu2 %v608_v4, %s561_s23 }
  0x2b   : > { %303 = vrot.lane.b32.xlu2 %v246_v6, %s560_s22 }
  0x6d   : > { %v223_v12 = vpop.permute.xlu2 %222 }
  0x6e   : > { %v229_v23 = vsel %vm227_vm1, %v223_v12, 0 }
  0x6f   : > { %238 = vmatpush.bf16.msra.mxu1 %v229_v23 }
  0x75   : > { %v306_v13 = vpop.permute.xlu2 %305 }
  0x76   : > { %v311_v24 = vsel %vm187_vm0, %v306_v13, 0 }
  0x77   : > { %320 = vmatpush.bf16.xpose.msrb.mxu1 %v311_v24 }
  0x7d   : > { %v362_v17 = vpop.permute.xlu2 %361 }
  0x7e   : > { %v367_v18 = vsel %vm187_vm0, %v362_v17, 0 }
  0x7f   : > { %376 = vmatpush.bf16.xpose.msrb.mxu0 %v367_v18 }
  0x85   : > { %v304_v31 = vpop.permute.xlu2 %303 }
  0x94   : > { %v203_v8 = vpop.f32.mrf.mxu0 }
  0x95   : > { %v204_v9 = vadd.f32 %v203_v8, %v186_v7 }
  0x97   : > { %v207_v10 = vsel %vm187_vm0, %v204_v9, -inf }
  0x98   : > { %208 = vmax.xlane.f32.xlu0 %v207_v10 }
  0x9c   : > { %v205_v11 = vpop.f32.mrf.mxu0 }
  0xac   : > { %249 = vrot.lane.b32.xlu0 %v608_v4, %s562_s26 }
  0xb4   : > { %359 = vrot.lane.b32.xlu0 %v246_v6, %s561_s23 }
 0x10b   : > { %v209_v14 = vpop.xlane.xlu0 %208 }
 0x10c   : > { %v210_v15 = vsub.f32 %v204_v9, %v209_v14 }
 0x10e   : > { %v211_v16 = vmul.f32 1.442695, %v210_v15 }
 0x110   : > { %535 = vpow2.f32 %v211_v16 }
 0x116   : > { %v536_v19 = vpop.eup %535 }
 0x117   : > { %v213_v20 = vsel %vm187_vm0, %v536_v19, 0.0 }
 0x118   : > { %214 = vadd.xlane.f32.xlu1 %v213_v20 }
 0x11e   : > { %v250_v21 = vpop.permute.xlu0 %249 }
 0x11f   : > { %v255_v25 = vsel %vm187_vm0, %v250_v21, 0 }
 0x120   : > { %264 = vmatpush.bf16.xpose.msra.mxu2 %v255_v25 }
 0x126   : > { %v360_v22 = vpop.permute.xlu0 %359 }
 0x127   : > { %513 = vmatmul.msk.bf16.vlgmr.msrb.gmra.mxu0 %vm187_vm0, %v360_v22 }
 0x131   : > { %247 = vrot.lane.b32.xlu1 %v246_v6, %s562_s26 }
 0x18b   : > { %v215_v26 = vpop.xlane.xlu1 %214 }
 0x18c   : > { %537 = vrcp.f32 %v215_v26 }
 0x192   : > { %v538_v27 = vpop.eup %537 }
 0x193   : > { %v217_v28 = vmul.f32 %v538_v27, %v536_v19 }
 0x195   : > { %v218_v29 = vpack.c.bf16 %v217_v28, %v217_v28 }
 0x197   : > { %508 = vmatmul.msk.bf16.vlgmr.msra.gmra.mxu1 %vm187_vm0, %v218_v29 }
 0x1a3   : > { %v248_v30 = vpop.permute.xlu1 %247 }
 0x1a4   : > { %509 = vmatmul.msk.bf16.vlgmr.msra.gmra.mxu2 %vm187_vm0, %v248_v30  ;;  %v378_v32 = vpop.f32.mrf.mxu0 }
 0x1a5   : > { %v379_v33 = vadd.f32 %v378_v32, %v186_v7 }
 0x1a7   : > { %511 = vmatmul.msk.bf16.vlgmr.msrb.gmra.mxu1 %vm187_vm0, %v304_v31  ;;  %v382_v34 = vsel %vm187_vm0, %v379_v33, -inf }
 0x1a8   : > { %383 = vmax.xlane.f32.xlu0 %v382_v34 }
 0x1ac   : > { %v380_v35 = vpop.f32.mrf.mxu0 }
 0x214   : > { %v628_v36 = vpop.f32.mrf.mxu1 }
 0x21b   : > { %v384_v48 = vpop.xlane.xlu0 %383 }
 0x21c   : > { %v242_v37 = vpop.f32.mrf.mxu1  ;;  %v385_v52 = vsub.f32 %v379_v33, %v384_v48 }
 0x21e   : > { %v386_v54 = vmul.f32 1.442695, %v385_v52 }
 0x224   : > { %v322_v38 = vpop.f32.mrf.mxu1 }
 0x225   : > { %v323_v39 = vadd.f32 %v322_v38, %v186_v7 }
 0x227   : > { %v266_v40 = vpop.f32.mrf.mxu2  ;;  %v326_v41 = vsel %vm187_vm0, %v323_v39, -inf }
 0x228   : > { %v267_v42 = vadd.f32 %v266_v40, %v186_v7  ;;  %327 = vmax.xlane.f32.xlu1 %v326_v41 }
 0x22a   : > { %v270_v43 = vsel %vm187_vm0, %v267_v42, -inf }
 0x22b   : > { %271 = vmax.xlane.f32.xlu2 %v270_v43 }
 0x22c   : > { %v324_v44 = vpop.f32.mrf.mxu1 }
 0x22f   : > { %v268_v45 = vpop.f32.mrf.mxu2 }
 0x241   : > { %282 = vrot.lane.b32.xlu1 %v608_v4, %s563_s27 }
 0x29b   : > { %v328_v46 = vpop.xlane.xlu1 %327 }
 0x29c   : > { %v329_v47 = vsub.f32 %v323_v39, %v328_v46 }
 0x29e   : > { %v330_v49 = vmul.f32 1.442695, %v329_v47  ;;  %v272_v50 = vpop.xlane.xlu2 %271 }
 0x29f   : > { %v273_v51 = vsub.f32 %v267_v42, %v272_v50 }
 0x2a0   : > { %539 = vpow2.f32 %v330_v49 }
 0x2a1   : > { %v274_v53 = vmul.f32 1.442695, %v273_v51 }
 0x2a3   : > { %541 = vpow2.f32 %v274_v53 }
 0x2a4   : > { %543 = vpow2.f32 %v386_v54 }
 0x2a6   : > { %v540_v55 = vpop.eup %539 }
 0x2a7   : > { %v332_v56 = vsel %vm187_vm0, %v540_v55, 0.0 }
 0x2a8   : > { %333 = vadd.xlane.f32.xlu0 %v332_v56 }
 0x2a9   : > { %v542_v57 = vpop.eup %541 }
 0x2aa   : > { %v276_v58 = vsel %vm187_vm0, %v542_v57, 0.0  ;;  %v544_v59 = vpop.eup %543 }
 0x2ab   : > { %277 = vadd.xlane.f32.xlu2 %v276_v58  ;;  %v388_v60 = vsel %vm187_vm0, %v544_v59, 0.0 }
 0x2b3   : > { %389 = vadd.xlane.f32.xlu2 %v388_v60  ;;  %v283_v61 = vpop.permute.xlu1 %282 }
 0x2b4   : > { %v288_v62 = vsel %vm227_vm1, %v283_v61, 0 }
 0x2b5   : > { %297 = vmatpush.bf16.msra.mxu3 %v288_v62 }
 0x2bc   : > { %338 = vrot.lane.b32.xlu0 %v608_v4, %s564_s28 }
 0x2cb   : > { %394 = vrot.lane.b32.xlu2 %v608_v4, %s565_s29 }
 0x31b   : > { %v334_v1 = vpop.xlane.xlu0 %333 }
 0x31e   : > { %v278_v63 = vpop.xlane.xlu2 %277 }
 0x31f   : > { %545 = vrcp.f32 %v278_v63 }
 0x325   : > { %v546_v0 = vpop.eup %545 }
 0x326   : > { %v390_v2 = vpop.xlane.xlu2 %389  ;;  %v280_v3 = vmul.f32 %v546_v0, %v542_v57 }
 0x327   : > { %547 = vrcp.f32 %v390_v2 }
 0x328   : > { %v281_v5 = vpack.c.bf16 %v280_v3, %v280_v3  ;;  %549 = vrcp.f32 %v334_v1 }
 0x32a   : > { %510 = vmatmul.msk.bf16.vlgmr.msra.gmra.mxu3 %vm187_vm0, %v281_v5 }
 0x32d   : > { %v548_v6 = vpop.eup %547 }
 0x32e   : > { %v392_v7 = vmul.f32 %v548_v6, %v544_v59  ;;  %v395_v8 = vpop.permute.xlu2 %394  ;;  %v339_v9 = vpop.permute.xlu0 %338 }
 0x32f   : > { %v344_v4 = vsel %vm227_vm1, %v339_v9, 0  ;;  %v400_v10 = vsel %vm227_vm1, %v395_v8, 0  ;;  %v550_v12 = vpop.eup %549 }
 0x330   : > { %353 = vmatpush.bf16.msrb.mxu3 %v344_v4  ;;  %409 = vmatpush.bf16.msrb.mxu2 %v400_v10  ;;  %v393_v11 = vpack.c.bf16 %v392_v7, %v392_v7  ;;  %v336_v13 = vmul.f32 %v550_v12, %v540_v55 }
 0x332   : > { %v337_v14 = vpack.c.bf16 %v336_v13, %v336_v13 }
 0x333   : > { %514 = vmatmul.msk.bf16.vlgmr.msrb.gmra.mxu2 %vm187_vm0, %v393_v11 }
 0x33a   : > { %512 = vmatmul.msk.bf16.vlgmr.msrb.gmra.mxu3 %vm187_vm0, %v337_v14 }
 0x3ad   : > { %v299_v15 = vpop.f32.mrf.mxu3 }
 0x3ae   : > { %416 = vrot.lane.b32.xlu1 %v299_v15, %s566_s30 }
 0x3b5   : > { %v301_v16 = vpop.f32.mrf.mxu3 }
 0x3b6   : > { %v411_v17 = vpop.f32.mrf.mxu2 }
 0x3b7   : > { %424 = vrot.lane.b32.xlu1 %v411_v17, %s567_s4 }
 0x3bd   : > { %v355_v18 = vpop.f32.mrf.mxu3 }
 0x3be   : > { %v413_v19 = vpop.f32.mrf.mxu2  ;;  %420 = vrot.lane.b32.xlu0 %v355_v18, %s568_s5 }
 0x3c5   : > { %v357_v20 = vpop.f32.mrf.mxu3 }
 0x420   : > { %v417_v21 = vpop.permute.xlu1 %416 }
 0x421   : > { %v427_v22 = vsel %vm187_vm0, %v628_v36, %v417_v21 }
 0x429   : > { %v425_v24 = vpop.permute.xlu1 %424 }
 0x430   : > { %v421_v23 = vpop.permute.xlu0 %420 }
 0x431   : > { %v429_v25 = vsel %vm428_vm2, %v427_v22, %v421_v23 }
 0x432   : > { %v431_v26 = vsel %vm430_vm3, %v429_v25, %v425_v24 }
 0x433   : > { %433 = vst.msk [vmem:[%s182_s9] sm:$0xff] %vm432_vm4, %v431_v26 }
 0x434 PF: > { %s13_s12 = sadd.s32 1, %s557_s12  }
 0x435   : > { %p10_p4 = scmp.ge.s32.totalorder %s13_s12, 4  }
 0x437   :  { %12 = sbr.rel (!%p10_p4) target bundleno = 1 (0x1), region = 65 }

</bundles_post_ra>
